<compile_context>
chip_gen: v5e
topology: v5e:2x2
jax: 0.10.0
libtpu: 0.0.40
codegen_flags: <defaults>
</compile_context>

<pallas_src>
import numpy as np
import jax
import jax.numpy as jnp
from jax import lax
from jax.experimental import pallas as pl
from jax.experimental.pallas import tpu as pltpu

# ----------------------------- model geometry ------------------------------
H_IN = 16                      # input spatial size (square); input is (N, 3, 16, 16)
W_IN = 16
C_IN = 3
KS = 3                         # conv kernel size, stride 1, SAME padding
BASE_FILTERS = 12
C1 = BASE_FILTERS              # 12 channels after conv1
C2 = BASE_FILTERS * 2          # 24 channels after conv2
NUM_CLASSES = 40
H1 = H_IN // 2                 # 8  spatial after pool1
H2 = H1 // 2                   # 4  spatial after pool2
HP = H_IN + 2                  # 18 zero-padded rows for conv1
WPC = (W_IN + 2) * C_IN        # 54 lanes of one zero-padded image row
K1 = 176                       # conv1 K: 3 kh taps * 54 = 162, padded to 176
L1 = W_IN * C1                 # 192 conv1 output lanes (w=16 x C1=12)
L2 = H1 * C2                   # 192 conv2 output lanes (w=8  x C2=24)
K2 = L1 // 2                   # 96 pooled conv1 lanes = conv2 K
KF = L2 // 2                   # 96 pooled conv2 lanes = FC K (per pooled row)
NC_PAD = 128                   # lane-dense padded class dim
MAX_TB = 128                   # batch tile (samples per grid step)


def _round_up(v, m):
    return (v + m - 1) // m * m


# ------------------------------ fused kernel -------------------------------
def _fused_cnn_kernel(xp_ref, w1_ref, b1_ref, w2_ref, b2_ref, fcw_ref, fcb_ref,
                      out_ref, s2_ref):
    f32 = jnp.float32
    cdt = w1_ref.dtype                 # matmul operand dtype (bf16 or f32)
    tb = xp_ref.shape[1]               # samples in this batch block (static)

    # ---- conv1: kh taps folded into K on the host -> ONE matmul, M = 16*tb --
    x = xp_ref[...].reshape(H_IN * tb, K1)                      # (16*tb, 176)
    acc1 = jnp.dot(x, w1_ref[...], preferred_element_type=f32)  # (16*tb, 192)

    # ---- 2x2 max-pool (rows: even/odd h slabs; cols: half-lane roll),
    # ---- then bias + ReLU in f32; compact to 96 lanes ----------------------
    a1 = acc1.reshape(H1, 2, tb, L1)
    mh = jnp.maximum(a1[:, 0], a1[:, 1]).reshape(H1 * tb, L1)
    mp = jnp.maximum(mh, pltpu.roll(mh, L1 // 2, 1))
    x1 = jnp.maximum(mp[:, :K2] + b1_ref[...], 0.0)             # (8*tb, 96) f32

    # ---- stage conv2 input in the compute dtype (cast once); only the two
    # ---- zero-padding boundary rows are (re)written per step ---------------
    zrow = jnp.zeros((1, tb, K2), s2_ref.dtype)
    s2_ref[0:1] = zrow
    s2_ref[H1 + 1:H1 + 2] = zrow
    s2_ref[1:H1 + 1] = x1.astype(cdt).reshape(H1, tb, K2)

    # ---- conv2: 3 kh taps (kw + W zero-padding baked in), M = 8*tb ---------
    acc2 = jnp.dot(s2_ref[0:H1].reshape(H1 * tb, K2), w2_ref[0],
                   preferred_element_type=f32)
    for kh in range(1, KS):
        acc2 = acc2 + jnp.dot(s2_ref[kh:kh + H1].reshape(H1 * tb, K2),
                              w2_ref[kh], preferred_element_type=f32)

    # ---- 2x2 max-pool + bias + ReLU, compact to 96 lanes -------------------
    a2 = acc2.reshape(H2, 2, tb, L2)
    mh2 = jnp.maximum(a2[:, 0], a2[:, 1]).reshape(H2 * tb, L2)
    mp2 = jnp.maximum(mh2, pltpu.roll(mh2, L2 // 2, 1))
    x2 = jnp.maximum(mp2[:, :KF] + b2_ref[...], 0.0)            # (4*tb, 96) f32

    # ---- FC (NCHW flatten + class padding baked into fcw_ref), M = tb ------
    x2c = x2.astype(cdt)
    logits = jnp.dot(x2c[0:tb], fcw_ref[0], preferred_element_type=f32)
    for hp in range(1, H2):
        logits = logits + jnp.dot(x2c[hp * tb:(hp + 1) * tb], fcw_ref[hp],
                                  preferred_element_type=f32)
    logits = logits + fcb_ref[...]                              # (tb, 128) f32

    # ---- numerically stable log_softmax (padded classes have -1e30 bias) ---
    m = jnp.max(logits, axis=-1, keepdims=True)
    s = logits - m
    lse = jnp.log(jnp.sum(jnp.exp(s), axis=-1, keepdims=True))
    out_ref[...] = (s - lse).astype(out_ref.dtype)              # lane-dense store


# ------------------------------ host wrapper --------------------------------
@jax.jit
def custom_cnn_forward(baked, x_nchw):
    """Forward pass of CustomCNN (eval mode) via one fused, batch-blocked
    Pallas kernel."""
    n = x_nchw.shape[0]
    cdt = baked["w1"].dtype
    tb = min(MAX_TB, _round_up(n, 16))          # multiple of 16 (bf16 sublanes)
    n_pad = _round_up(n, tb)

    # (N,3,16,16) -> NHWC -> zero-pad spatial -> (n_pad, 18, 54)
    x = jnp.transpose(x_nchw, (0, 2, 3, 1))
    xp = jnp.pad(x, ((0, n_pad - n), (1, 1), (1, 1), (0, 0)))
    xp = xp.reshape(n_pad, HP, WPC)
    # fold the 3 kh taps into lanes: xp3[b, h, kh*54 + l] = xp[b, h+kh, l]
    xp3 = jnp.concatenate([xp[:, kh:kh + H_IN, :] for kh in range(KS)], axis=-1)
    xp3 = jnp.pad(xp3, ((0, 0), (0, 0), (0, K1 - KS * WPC)))    # (n_pad, 16, 176)
    xp3 = jnp.transpose(xp3, (1, 0, 2)).astype(cdt)             # (16, n_pad, 176)

    out = pl.pallas_call(
        _fused_cnn_kernel,
        out_shape=jax.ShapeDtypeStruct((n_pad, NC_PAD), jnp.float32),
        grid_spec=pltpu.PrefetchScalarGridSpec(
            num_scalar_prefetch=0,
            grid=(n_pad // tb,),
            in_specs=[
                pl.BlockSpec((H_IN, tb, K1), lambda i: (0, i, 0)),   # image (kh-folded)
                pl.BlockSpec((K1, L1), lambda i: (0, 0)),            # conv1 W
                pl.BlockSpec((1, K2), lambda i: (0, 0)),             # conv1 b (tiled)
                pl.BlockSpec((KS, K2, L2), lambda i: (0, 0, 0)),     # conv2 W
                pl.BlockSpec((1, KF), lambda i: (0, 0)),             # conv2 b (tiled)
                pl.BlockSpec((H2, KF, NC_PAD), lambda i: (0, 0, 0)), # fc W
                pl.BlockSpec((1, NC_PAD), lambda i: (0, 0)),         # fc b (padded)
            ],
            out_specs=pl.BlockSpec((tb, NC_PAD), lambda i: (i, 0)),
            scratch_shapes=[
                pltpu.VMEM((H1 + 2, tb, K2), cdt),   # conv2 staging (h-padded)
            ],
        ),
        compiler_params=pltpu.CompilerParams(
            dimension_semantics=("parallel",)),      # batch blocks -> megacore
    )(xp3, baked["w1"], baked["b1"], baked["w2"], baked["b2"],
      baked["fcw"], baked["fcb"])
    return out[:n, :NUM_CLASSES]


def bake_params(params, compute_dtype=jnp.bfloat16):
    """One-time host-side folding of im2col taps (kh into K for conv1), pool
    lane layout, NCHW flatten order and class padding into dense matrices."""
    (w1, b1), (w2, b2) = params["conv"]
    w1 = np.asarray(w1, np.float32)                   # (3,3,3,12)  HWIO
    b1 = np.asarray(b1, np.float32).reshape(-1)
    w2 = np.asarray(w2, np.float32)                   # (3,3,12,24) HWIO
    b2 = np.asarray(b2, np.float32).reshape(-1)
    fw = np.asarray(params["fc_w"], np.float32)       # (384, 40)
    fb = np.asarray(params["fc_b"], np.float32).reshape(-1)

    # conv1: input lane = kh*54 + w_pad*3 + cin ; output lane = dw*96 + wp*12 + co
    # with output pixel j = 2*wp + dw, so the 2x2-pool partner sits 96 lanes away.
    w1b = np.zeros((K1, L1), np.float32)
    for kh in range(KS):
        for kw in range(KS):
            for j in range(W_IN):
                wp, dw = j // 2, j % 2
                col = dw * (L1 // 2) + wp * C1
                row = kh * WPC + (j + kw) * C_IN
                w1b[row:row + C_IN, col:col + C1] = w1[kh, kw]
    b1t = np.tile(b1[None, :], (1, K2 // C1))                    # (1, 96)

    # conv2: input lane = wp_in*12 + c (compact pooled layout, 96 lanes)
    w2b = np.zeros((KS, K2, L2), np.float32)
    for kh in range(KS):
        for kw in range(KS):
            for j in range(H1):
                wp_in = j + kw - 1
                if 0 <= wp_in < H1:                  # implicit SAME zero padding in W
                    wp, dw = j // 2, j % 2
                    col = dw * (L2 // 2) + wp * C2
                    row = wp_in * C1
                    w2b[kh, row:row + C1, col:col + C2] = w2[kh, kw]
    b2t = np.tile(b2[None, :], (1, KF // C2))                    # (1, 96)

    # FC: x2[hp, wp*24 + co] is the activation at (co, hp, wp); PyTorch flattens
    # NCHW -> flat index co*16 + hp*4 + wp.  Classes padded 40 -> 128.
    fcwb = np.zeros((H2, KF, NC_PAD), np.float32)
    for hp in range(H2):
        for wp in range(H2):
            for co in range(C2):
                f = co * (H2 * H2) + hp * H2 + wp
                fcwb[hp, wp * C2 + co, :NUM_CLASSES] = fw[f]
    fcbp = np.full((1, NC_PAD), -1e30, np.float32)   # padded classes -> ~ -inf
    fcbp[0, :NUM_CLASSES] = fb

    return {
        "w1": jnp.asarray(w1b, compute_dtype),
        "b1": jnp.asarray(b1t, jnp.float32),
        "w2": jnp.asarray(w2b, compute_dtype),
        "b2": jnp.asarray(b2t, jnp.float32),
        "fcw": jnp.asarray(fcwb, compute_dtype),
        "fcb": jnp.asarray(fcbp, jnp.float32),
    }


# ----------------------------- params & reference ---------------------------
def init_params(key):
    params = {"conv": []}
    in_ch = C_IN
    for i in range(2):
        out_ch = BASE_FILTERS * 2 ** i
        key, kw_, kb_ = jax.random.split(key, 3)
        w = 0.1 * jax.random.normal(kw_, (KS, KS, in_ch, out_ch), jnp.float32)
        b = 0.1 * jax.random.normal(kb_, (out_ch,), jnp.float32)
        params["conv"].append((w, b))
        in_ch = out_ch
    flattened = in_ch * H2 * H2                              # 24 * 4 * 4 = 384
    key, kw_, kb_ = jax.random.split(key, 3)
    params["fc_w"] = 0.05 * jax.random.normal(kw_, (flattened, NUM_CLASSES), jnp.float32)
    params["fc_b"] = 0.05 * jax.random.normal(kb_, (NUM_CLASSES,), jnp.float32)
    return params


def reference_forward(params, x_nchw):
    """Pure-JAX reference of CustomCNN.forward (eval mode: dropout = identity)."""
    x = jnp.transpose(x_nchw, (0, 2, 3, 1))
    for (w, b) in params["conv"]:
        y = lax.conv_general_dilated(
            x, w, window_strides=(1, 1), padding="SAME",
            dimension_numbers=("NHWC", "HWIO", "NHWC"),
            precision=lax.Precision.HIGHEST) + b.reshape(1, 1, 1, -1)
        y = lax.reduce_window(y, -jnp.inf, lax.max,
                              (1, 2, 2, 1), (1, 2, 2, 1), "VALID")
        x = jnp.maximum(y, 0.0)
    flat = jnp.transpose(x, (0, 3, 1, 2)).reshape(x.shape[0], -1)
    logits = jnp.dot(flat, params["fc_w"],
                     precision=lax.Precision.HIGHEST) + params["fc_b"]
    return jax.nn.log_softmax(logits, axis=-1)


if __name__ == "__main__":
    key = jax.random.PRNGKey(0)
    kx, kp = jax.random.split(key)
    x = jax.random.normal(kx, (2, C_IN, H_IN, H_IN), jnp.float32)
    params = init_params(kp)
    ref = jax.block_until_ready(reference_forward(params, x))

    # f32 operand path (exactness check)
    out_f32 = jax.block_until_ready(
        custom_cnn_forward(bake_params(params, jnp.float32), x))
    assert out_f32.shape == (2, NUM_CLASSES), out_f32.shape
    assert bool(jnp.all(jnp.isfinite(out_f32)))
    assert bool(jnp.allclose(out_f32, ref, atol=2e-2, rtol=2e-2)), \
        float(jnp.max(jnp.abs(out_f32 - ref)))

    # bf16 MXU operand path (f32 accumulation / epilogue) -- fast path on all gens
    out_bf16 = jax.block_until_ready(
        custom_cnn_forward(bake_params(params, jnp.bfloat16), x))
    assert out_bf16.shape == (2, NUM_CLASSES)
    assert bool(jnp.all(jnp.isfinite(out_bf16)))
    assert bool(jnp.allclose(out_bf16, ref, atol=1.5e-1, rtol=1.5e-1)), \
        float(jnp.max(jnp.abs(out_bf16 - ref)))

    print("KERNEL_OK")
</pallas_src>

<mosaic_0001>
module attributes {stable_mosaic.version = 11 : i64} {
  func.func @_fused_cnn_kernel(%arg0: i32, %arg1: memref<16x16x176xf32, #tpu.memory_space<vmem>>, %arg2: memref<176x192xf32, #tpu.memory_space<vmem>>, %arg3: memref<1x96xf32, #tpu.memory_space<vmem>>, %arg4: memref<3x96x192xf32, #tpu.memory_space<vmem>>, %arg5: memref<1x96xf32, #tpu.memory_space<vmem>>, %arg6: memref<4x96x128xf32, #tpu.memory_space<vmem>>, %arg7: memref<1x128xf32, #tpu.memory_space<vmem>>, %arg8: memref<16x128xf32, #tpu.memory_space<vmem>>, %arg9: memref<10x16x96xf32, #tpu.memory_space<vmem>>) attributes {dimension_semantics = [#tpu.dimension_semantics<parallel>], iteration_bounds = array<i64: 1>, scalar_prefetch = 0 : i64, scratch_operands = 1 : i64, tpu.core_type = #tpu.core_type<tc>, window_params = [{transform_indices = @transform_0, window_bounds = array<i64: 16, 16, 176>}, {pipeline_mode = #tpu.pipeline_mode<synchronous>, transform_indices = @transform_1, window_bounds = array<i64: 176, 192>}, {pipeline_mode = #tpu.pipeline_mode<synchronous>, transform_indices = @transform_2, window_bounds = array<i64: 1, 96>}, {pipeline_mode = #tpu.pipeline_mode<synchronous>, transform_indices = @transform_3, window_bounds = array<i64: 3, 96, 192>}, {pipeline_mode = #tpu.pipeline_mode<synchronous>, transform_indices = @transform_4, window_bounds = array<i64: 1, 96>}, {pipeline_mode = #tpu.pipeline_mode<synchronous>, transform_indices = @transform_5, window_bounds = array<i64: 4, 96, 128>}, {pipeline_mode = #tpu.pipeline_mode<synchronous>, transform_indices = @transform_6, window_bounds = array<i64: 1, 128>}, {transform_indices = @transform_7, window_bounds = array<i64: 16, 128>}]} {
    %c0 = arith.constant 0 : index
    %c0_0 = arith.constant 0 : index
    %c0_1 = arith.constant 0 : index
    %0 = vector.load %arg1[%c0, %c0_0, %c0_1] : memref<16x16x176xf32, #tpu.memory_space<vmem>>, vector<16x16x176xf32>
    %1 = vector.shape_cast %0 : vector<16x16x176xf32> to vector<256x176xf32>
    %c0_2 = arith.constant 0 : index
    %c0_3 = arith.constant 0 : index
    %2 = vector.load %arg2[%c0_2, %c0_3] : memref<176x192xf32, #tpu.memory_space<vmem>>, vector<176x192xf32>
    %cst = arith.constant dense<0.000000e+00> : vector<256x192xf32>
    %3 = tpu.matmul %1, %2, %cst {dimension_numbers = #tpu.dot_dimension_numbers<[1], [0], [0], [1], [0, 0, 1, 1], [], []>} : vector<256x176xf32>, vector<176x192xf32>, vector<256x192xf32> -> vector<256x192xf32>
    %4 = vector.shape_cast %3 : vector<256x192xf32> to vector<8x2x16x192xf32>
    %5 = vector.extract_strided_slice %4 {offsets = [0, 0, 0, 0], sizes = [8, 1, 16, 192], strides = [1, 1, 1, 1]} : vector<8x2x16x192xf32> to vector<8x1x16x192xf32>
    %6 = vector.shape_cast %5 : vector<8x1x16x192xf32> to vector<8x16x192xf32>
    %7 = vector.extract_strided_slice %4 {offsets = [0, 1, 0, 0], sizes = [8, 1, 16, 192], strides = [1, 1, 1, 1]} : vector<8x2x16x192xf32> to vector<8x1x16x192xf32>
    %8 = vector.shape_cast %7 : vector<8x1x16x192xf32> to vector<8x16x192xf32>
    %9 = arith.maximumf %6, %8 : vector<8x16x192xf32>
    %10 = vector.shape_cast %9 : vector<8x16x192xf32> to vector<128x192xf32>
    %c96_i32 = arith.constant 96 : i32
    %11 = tpu.dynamic_rotate %10 by %c96_i32 dim 1 : vector<128x192xf32>, i32 -> vector<128x192xf32>
    %12 = arith.maximumf %10, %11 : vector<128x192xf32>
    %13 = vector.extract_strided_slice %12 {offsets = [0, 0], sizes = [128, 96], strides = [1, 1]} : vector<128x192xf32> to vector<128x96xf32>
    %c0_4 = arith.constant 0 : index
    %c0_5 = arith.constant 0 : index
    %14 = vector.load %arg3[%c0_4, %c0_5] : memref<1x96xf32, #tpu.memory_space<vmem>>, vector<1x96xf32>
    %15 = vector.broadcast %14 : vector<1x96xf32> to vector<128x96xf32>
    %16 = arith.addf %13, %15 : vector<128x96xf32>
    %cst_6 = arith.constant 0.000000e+00 : f32
    %17 = vector.broadcast %cst_6 : f32 to vector<128x96xf32>
    %18 = arith.maximumf %16, %17 : vector<128x96xf32>
    %cst_7 = arith.constant 0.000000e+00 : f32
    %19 = vector.broadcast %cst_7 : f32 to vector<1x16x96xf32>
    %c0_8 = arith.constant 0 : index
    %c0_9 = arith.constant 0 : index
    %c0_10 = arith.constant 0 : index
    %20 = vector.load %arg9[%c0_8, %c0_9, %c0_10] : memref<10x16x96xf32, #tpu.memory_space<vmem>>, vector<1x16x96xf32>
    tpu.vector_store %arg9[%c0_8, %c0_9, %c0_10], %19 {strides = array<i32>} : memref<10x16x96xf32, #tpu.memory_space<vmem>>, vector<1x16x96xf32>,
    %c9 = arith.constant 9 : index
    %c0_11 = arith.constant 0 : index
    %c0_12 = arith.constant 0 : index
    %21 = vector.load %arg9[%c9, %c0_11, %c0_12] : memref<10x16x96xf32, #tpu.memory_space<vmem>>, vector<1x16x96xf32>
    tpu.vector_store %arg9[%c9, %c0_11, %c0_12], %19 {strides = array<i32>} : memref<10x16x96xf32, #tpu.memory_space<vmem>>, vector<1x16x96xf32>,
    %22 = vector.shape_cast %18 : vector<128x96xf32> to vector<8x16x96xf32>
    %c1 = arith.constant 1 : index
    %c0_13 = arith.constant 0 : index
    %c0_14 = arith.constant 0 : index
    %23 = vector.load %arg9[%c1, %c0_13, %c0_14] : memref<10x16x96xf32, #tpu.memory_space<vmem>>, vector<8x16x96xf32>
    tpu.vector_store %arg9[%c1, %c0_13, %c0_14], %22 {strides = array<i32>} : memref<10x16x96xf32, #tpu.memory_space<vmem>>, vector<8x16x96xf32>,
    %c0_15 = arith.constant 0 : index
    %c0_16 = arith.constant 0 : index
    %c0_17 = arith.constant 0 : index
    %24 = vector.load %arg9[%c0_15, %c0_16, %c0_17] : memref<10x16x96xf32, #tpu.memory_space<vmem>>, vector<8x16x96xf32>
    %25 = vector.shape_cast %24 : vector<8x16x96xf32> to vector<128x96xf32>
    %c0_18 = arith.constant 0 : index
    %c0_19 = arith.constant 0 : index
    %c0_20 = arith.constant 0 : index
    %26 = vector.load %arg4[%c0_18, %c0_19, %c0_20] : memref<3x96x192xf32, #tpu.memory_space<vmem>>, vector<1x96x192xf32>
    %27 = vector.shape_cast %26 : vector<1x96x192xf32> to vector<96x192xf32>
    %cst_21 = arith.constant dense<0.000000e+00> : vector<128x192xf32>
    %28 = tpu.matmul %25, %27, %cst_21 {dimension_numbers = #tpu.dot_dimension_numbers<[1], [0], [0], [1], [0, 0, 1, 1], [], []>} : vector<128x96xf32>, vector<96x192xf32>, vector<128x192xf32> -> vector<128x192xf32>
    %c1_22 = arith.constant 1 : index
    %c0_23 = arith.constant 0 : index
    %c0_24 = arith.constant 0 : index
    %29 = vector.load %arg9[%c1_22, %c0_23, %c0_24] : memref<10x16x96xf32, #tpu.memory_space<vmem>>, vector<8x16x96xf32>
    %30 = vector.shape_cast %29 : vector<8x16x96xf32> to vector<128x96xf32>
    %c1_25 = arith.constant 1 : index
    %c0_26 = arith.constant 0 : index
    %c0_27 = arith.constant 0 : index
    %31 = vector.load %arg4[%c1_25, %c0_26, %c0_27] : memref<3x96x192xf32, #tpu.memory_space<vmem>>, vector<1x96x192xf32>
    %32 = vector.shape_cast %31 : vector<1x96x192xf32> to vector<96x192xf32>
    %cst_28 = arith.constant dense<0.000000e+00> : vector<128x192xf32>
    %33 = tpu.matmul %30, %32, %cst_28 {dimension_numbers = #tpu.dot_dimension_numbers<[1], [0], [0], [1], [0, 0, 1, 1], [], []>} : vector<128x96xf32>, vector<96x192xf32>, vector<128x192xf32> -> vector<128x192xf32>
    %34 = arith.addf %28, %33 : vector<128x192xf32>
    %c2 = arith.constant 2 : index
    %c0_29 = arith.constant 0 : index
    %c0_30 = arith.constant 0 : index
    %35 = vector.load %arg9[%c2, %c0_29, %c0_30] : memref<10x16x96xf32, #tpu.memory_space<vmem>>, vector<8x16x96xf32>
    %36 = vector.shape_cast %35 : vector<8x16x96xf32> to vector<128x96xf32>
    %c2_31 = arith.constant 2 : index
    %c0_32 = arith.constant 0 : index
    %c0_33 = arith.constant 0 : index
    %37 = vector.load %arg4[%c2_31, %c0_32, %c0_33] : memref<3x96x192xf32, #tpu.memory_space<vmem>>, vector<1x96x192xf32>
    %38 = vector.shape_cast %37 : vector<1x96x192xf32> to vector<96x192xf32>
    %cst_34 = arith.constant dense<0.000000e+00> : vector<128x192xf32>
    %39 = tpu.matmul %36, %38, %cst_34 {dimension_numbers = #tpu.dot_dimension_numbers<[1], [0], [0], [1], [0, 0, 1, 1], [], []>} : vector<128x96xf32>, vector<96x192xf32>, vector<128x192xf32> -> vector<128x192xf32>
    %40 = arith.addf %34, %39 : vector<128x192xf32>
    %41 = vector.shape_cast %40 : vector<128x192xf32> to vector<4x2x16x192xf32>
    %42 = vector.extract_strided_slice %41 {offsets = [0, 0, 0, 0], sizes = [4, 1, 16, 192], strides = [1, 1, 1, 1]} : vector<4x2x16x192xf32> to vector<4x1x16x192xf32>
    %43 = vector.shape_cast %42 : vector<4x1x16x192xf32> to vector<4x16x192xf32>
    %44 = vector.extract_strided_slice %41 {offsets = [0, 1, 0, 0], sizes = [4, 1, 16, 192], strides = [1, 1, 1, 1]} : vector<4x2x16x192xf32> to vector<4x1x16x192xf32>
    %45 = vector.shape_cast %44 : vector<4x1x16x192xf32> to vector<4x16x192xf32>
    %46 = arith.maximumf %43, %45 : vector<4x16x192xf32>
    %47 = vector.shape_cast %46 : vector<4x16x192xf32> to vector<64x192xf32>
    %c96_i32_35 = arith.constant 96 : i32
    %48 = tpu.dynamic_rotate %47 by %c96_i32_35 dim 1 : vector<64x192xf32>, i32 -> vector<64x192xf32>
    %49 = arith.maximumf %47, %48 : vector<64x192xf32>
    %50 = vector.extract_strided_slice %49 {offsets = [0, 0], sizes = [64, 96], strides = [1, 1]} : vector<64x192xf32> to vector<64x96xf32>
    %c0_36 = arith.constant 0 : index
    %c0_37 = arith.constant 0 : index
    %51 = vector.load %arg5[%c0_36, %c0_37] : memref<1x96xf32, #tpu.memory_space<vmem>>, vector<1x96xf32>
    %52 = vector.broadcast %51 : vector<1x96xf32> to vector<64x96xf32>
    %53 = arith.addf %50, %52 : vector<64x96xf32>
    %cst_38 = arith.constant 0.000000e+00 : f32
    %54 = vector.broadcast %cst_38 : f32 to vector<64x96xf32>
    %55 = arith.maximumf %53, %54 : vector<64x96xf32>
    %56 = vector.extract_strided_slice %55 {offsets = [0, 0], sizes = [16, 96], strides = [1, 1]} : vector<64x96xf32> to vector<16x96xf32>
    %c0_39 = arith.constant 0 : index
    %c0_40 = arith.constant 0 : index
    %c0_41 = arith.constant 0 : index
    %57 = vector.load %arg6[%c0_39, %c0_40, %c0_41] : memref<4x96x128xf32, #tpu.memory_space<vmem>>, vector<1x96x128xf32>
    %58 = vector.shape_cast %57 : vector<1x96x128xf32> to vector<96x128xf32>
    %cst_42 = arith.constant dense<0.000000e+00> : vector<16x128xf32>
    %59 = tpu.matmul %56, %58, %cst_42 {dimension_numbers = #tpu.dot_dimension_numbers<[1], [0], [0], [1], [0, 0, 1, 1], [], []>} : vector<16x96xf32>, vector<96x128xf32>, vector<16x128xf32> -> vector<16x128xf32>
    %60 = vector.extract_strided_slice %55 {offsets = [16, 0], sizes = [16, 96], strides = [1, 1]} : vector<64x96xf32> to vector<16x96xf32>
    %c1_43 = arith.constant 1 : index
    %c0_44 = arith.constant 0 : index
    %c0_45 = arith.constant 0 : index
    %61 = vector.load %arg6[%c1_43, %c0_44, %c0_45] : memref<4x96x128xf32, #tpu.memory_space<vmem>>, vector<1x96x128xf32>
    %62 = vector.shape_cast %61 : vector<1x96x128xf32> to vector<96x128xf32>
    %cst_46 = arith.constant dense<0.000000e+00> : vector<16x128xf32>
    %63 = tpu.matmul %60, %62, %cst_46 {dimension_numbers = #tpu.dot_dimension_numbers<[1], [0], [0], [1], [0, 0, 1, 1], [], []>} : vector<16x96xf32>, vector<96x128xf32>, vector<16x128xf32> -> vector<16x128xf32>
    %64 = arith.addf %59, %63 : vector<16x128xf32>
    %65 = vector.extract_strided_slice %55 {offsets = [32, 0], sizes = [16, 96], strides = [1, 1]} : vector<64x96xf32> to vector<16x96xf32>
    %c2_47 = arith.constant 2 : index
    %c0_48 = arith.constant 0 : index
    %c0_49 = arith.constant 0 : index
    %66 = vector.load %arg6[%c2_47, %c0_48, %c0_49] : memref<4x96x128xf32, #tpu.memory_space<vmem>>, vector<1x96x128xf32>
    %67 = vector.shape_cast %66 : vector<1x96x128xf32> to vector<96x128xf32>
    %cst_50 = arith.constant dense<0.000000e+00> : vector<16x128xf32>
    %68 = tpu.matmul %65, %67, %cst_50 {dimension_numbers = #tpu.dot_dimension_numbers<[1], [0], [0], [1], [0, 0, 1, 1], [], []>} : vector<16x96xf32>, vector<96x128xf32>, vector<16x128xf32> -> vector<16x128xf32>
    %69 = arith.addf %64, %68 : vector<16x128xf32>
    %70 = vector.extract_strided_slice %55 {offsets = [48, 0], sizes = [16, 96], strides = [1, 1]} : vector<64x96xf32> to vector<16x96xf32>
    %c3 = arith.constant 3 : index
    %c0_51 = arith.constant 0 : index
    %c0_52 = arith.constant 0 : index
    %71 = vector.load %arg6[%c3, %c0_51, %c0_52] : memref<4x96x128xf32, #tpu.memory_space<vmem>>, vector<1x96x128xf32>
    %72 = vector.shape_cast %71 : vector<1x96x128xf32> to vector<96x128xf32>
    %cst_53 = arith.constant dense<0.000000e+00> : vector<16x128xf32>
    %73 = tpu.matmul %70, %72, %cst_53 {dimension_numbers = #tpu.dot_dimension_numbers<[1], [0], [0], [1], [0, 0, 1, 1], [], []>} : vector<16x96xf32>, vector<96x128xf32>, vector<16x128xf32> -> vector<16x128xf32>
    %74 = arith.addf %69, %73 : vector<16x128xf32>
    %c0_54 = arith.constant 0 : index
    %c0_55 = arith.constant 0 : index
    %75 = vector.load %arg7[%c0_54, %c0_55] : memref<1x128xf32, #tpu.memory_space<vmem>>, vector<1x128xf32>
    %76 = vector.broadcast %75 : vector<1x128xf32> to vector<16x128xf32>
    %77 = arith.addf %74, %76 : vector<16x128xf32>
    %cst_56 = arith.constant dense<0xFF800000> : vector<16xf32>
    %78 = vector.multi_reduction <maximumf>, %77, %cst_56 [1] : vector<16x128xf32> to vector<16xf32>
    %79 = vector.shape_cast %78 : vector<16xf32> to vector<16x1xf32>
    %80 = vector.broadcast %79 : vector<16x1xf32> to vector<16x128xf32>
    %81 = arith.subf %77, %80 : vector<16x128xf32>
    %82 = math.exp %81 : vector<16x128xf32>
    %cst_57 = arith.constant dense<0.000000e+00> : vector<16xf32>
    %83 = vector.multi_reduction <add>, %82, %cst_57 [1] : vector<16x128xf32> to vector<16xf32>
    %84 = vector.shape_cast %83 : vector<16xf32> to vector<16x1xf32>
    %85 = math.log %84 : vector<16x1xf32>
    %86 = vector.broadcast %85 : vector<16x1xf32> to vector<16x128xf32>
    %87 = arith.subf %81, %86 : vector<16x128xf32>
    %c0_58 = arith.constant 0 : index
    %c0_59 = arith.constant 0 : index
    %88 = vector.load %arg8[%c0_58, %c0_59] : memref<16x128xf32, #tpu.memory_space<vmem>>, vector<16x128xf32>
    tpu.vector_store %arg8[%c0_58, %c0_59], %87 {strides = array<i32>} : memref<16x128xf32, #tpu.memory_space<vmem>>, vector<16x128xf32>,
    return
  }
  func.func @transform_0(%arg0: i32) -> (i32, i32, i32) {
    %c0_i32 = arith.constant 0 : i32
    %c0_i32_0 = arith.constant 0 : i32
    %c0_i32_1 = arith.constant 0 : i32
    return %c0_i32, %arg0, %c0_i32_0 : i32, i32, i32
  }
  func.func @transform_1(%arg0: i32) -> (i32, i32) {
    %c0_i32 = arith.constant 0 : i32
    %c0_i32_0 = arith.constant 0 : i32
    %c0_i32_1 = arith.constant 0 : i32
    return %c0_i32, %c0_i32_0 : i32, i32
  }
  func.func @transform_2(%arg0: i32) -> (i32, i32) {
    %c0_i32 = arith.constant 0 : i32
    %c0_i32_0 = arith.constant 0 : i32
    %c0_i32_1 = arith.constant 0 : i32
    return %c0_i32, %c0_i32_0 : i32, i32
  }
  func.func @transform_3(%arg0: i32) -> (i32, i32, i32) {
    %c0_i32 = arith.constant 0 : i32
    %c0_i32_0 = arith.constant 0 : i32
    %c0_i32_1 = arith.constant 0 : i32
    %c0_i32_2 = arith.constant 0 : i32
    return %c0_i32, %c0_i32_0, %c0_i32_1 : i32, i32, i32
  }
  func.func @transform_4(%arg0: i32) -> (i32, i32) {
    %c0_i32 = arith.constant 0 : i32
    %c0_i32_0 = arith.constant 0 : i32
    %c0_i32_1 = arith.constant 0 : i32
    return %c0_i32, %c0_i32_0 : i32, i32
  }
  func.func @transform_5(%arg0: i32) -> (i32, i32, i32) {
    %c0_i32 = arith.constant 0 : i32
    %c0_i32_0 = arith.constant 0 : i32
    %c0_i32_1 = arith.constant 0 : i32
    %c0_i32_2 = arith.constant 0 : i32
    return %c0_i32, %c0_i32_0, %c0_i32_1 : i32, i32, i32
  }
  func.func @transform_6(%arg0: i32) -> (i32, i32) {
    %c0_i32 = arith.constant 0 : i32
    %c0_i32_0 = arith.constant 0 : i32
    %c0_i32_1 = arith.constant 0 : i32
    return %c0_i32, %c0_i32_0 : i32, i32
  }
  func.func @transform_7(%arg0: i32) -> (i32, i32) {
    %c0_i32 = arith.constant 0 : i32
    %c0_i32_0 = arith.constant 0 : i32
    return %arg0, %c0_i32 : i32, i32
  }
}

</mosaic_0001>

<bundles_post_ra>
// kernel: custom_cnn_forward.1
= control target key start
LH: loop header
LB: loop body
LE: loop exit
PB: predicated region body
PF: predicated region fallthrough
CT: control target
= control target key end

     0   :  { %vm134_vm0 = vcmask 392192   ;;  %s2270_s18 = smov 64   ;;  %vm715_vm1 = vcmask 1048064   ;;  %vm945_vm2 = vcmask 785408   ;;  %vm860_vm3 = vcmask 261120   ;;  %s4081_s1 = inlined_call_operand.vmem [shape: f32[176,192], index: 1, kind: input, shape index: {}]   ;;  %s4082_s0 = inlined_call_operand.vmem [shape: f32[16,16,176], index: 0, kind: input, shape index: {}]   ;;  %s4083_s3 = inlined_call_operand.vmem [shape: f32[3,96,192], index: 3, kind: input, shape index: {}]   ;;  %s4084_s2 = inlined_call_operand.vmem [shape: f32[1,96], index: 2, kind: input, shape index: {}]   ;;  %s4085_s4 = inlined_call_operand.vmem [shape: f32[1,96], index: 4, kind: input, shape index: {}]   ;;  %s4086_s5 = inlined_call_operand.vmem [shape: f32[4,96,128], index: 5, kind: input, shape index: {}]   ;;  %s4087_s6 = inlined_call_operand.vmem [shape: f32[1,128], index: 6, kind: input, shape index: {}]   ;;  %s4088_s7 = inlined_call_operand.vmem [shape: f32[16,128], index: 7, kind: output, shape index: {}]  }
   0x1   :  { %v120_v0 = vld [vmem:[%s4081_s1 + $0xf0] sm:$0xff]  ;;  %v121_v1 = vld [vmem:[%s4081_s1 + $0xf8] sm:$0xff]  ;;  %v118_v2 = vld [vmem:[%s4081_s1 + $0xe0] sm:$0xff] }
   0x2   :  { %231 = vmatpush.msra.mxu0 %v120_v0  ;;  %457 = vmatpush.msra.mxu2 %v121_v1  ;;  %v119_v3 = vld [vmem:[%s4081_s1 + $0xe8] sm:$0xff]  ;;  %v116_v4 = vld [vmem:[%s4081_s1 + $0xd0] sm:$0xff]  ;;  %v117_v5 = vld [vmem:[%s4081_s1 + $0xd8] sm:$0xff] }
   0x3   :  { %v114_v6 = vld [vmem:[%s4081_s1 + $0xc0] sm:$0xff]  ;;  %v115_v7 = vld [vmem:[%s4081_s1 + $0xc8] sm:$0xff]  ;;  %v112_v8 = vld [vmem:[%s4081_s1 + $0xb0] sm:$0xff] }
   0x4   :  { %232 = vmatpush.msra.mxu0 %v118_v2  ;;  %458 = vmatpush.msra.mxu2 %v119_v3  ;;  %v113_v9 = vld [vmem:[%s4081_s1 + $0xb8] sm:$0xff]  ;;  %v110_v10 = vld [vmem:[%s4081_s1 + $0xa0] sm:$0xff]  ;;  %v111_v11 = vld [vmem:[%s4081_s1 + $0xa8] sm:$0xff] }
   0x5   :  { %v108_v12 = vld [vmem:[%s4081_s1 + $0x90] sm:$0xff]  ;;  %v109_v13 = vld [vmem:[%s4081_s1 + $0x98] sm:$0xff]  ;;  %v106_v15 = vld [vmem:[%s4081_s1 + $0x80] sm:$0xff] }
   0x6   :  { %233 = vmatpush.msra.mxu0 %v116_v4  ;;  %459 = vmatpush.msra.mxu2 %v117_v5  ;;  %v132_v14 = vld [vmem:[%s4081_s1 + $0x150] sm:$0xff]  ;;  %v107_v16 = vld [vmem:[%s4081_s1 + $0x88] sm:$0xff]  ;;  %v105_v18 = vld [vmem:[%s4081_s1 + $0x78] sm:$0xff] }
   0x7   :  { %2244 = vmatpush.msra.mxu1 %v132_v14  ;;  %v104_v17 = vld [vmem:[%s4081_s1 + $0x70] sm:$0xff]  ;;  %v102_v19 = vld [vmem:[%s4081_s1 + $0x60] sm:$0xff]  ;;  %v103_v20 = vld [vmem:[%s4081_s1 + $0x68] sm:$0xff] }
   0x8   :  { %234 = vmatpush.msra.mxu0 %v114_v6  ;;  %460 = vmatpush.msra.mxu2 %v115_v7  ;;  %v130_v21 = vld [vmem:[%s4081_s1 + $0x140] sm:$0xff]  ;;  %v100_v22 = vld [vmem:[%s4081_s1 + $0x50] sm:$0xff]  ;;  %v101_v23 = vld [vmem:[%s4081_s1 + $0x58] sm:$0xff] }
   0x9   :  { %2245 = vmatpush.msra.mxu1 %v130_v21  ;;  %v98_v24 = vld [vmem:[%s4081_s1 + $0x40] sm:$0xff]  ;;  %v99_v25 = vld [vmem:[%s4081_s1 + $0x48] sm:$0xff]  ;;  %v96_v26 = vld [vmem:[%s4081_s1 + $0x30] sm:$0xff] }
   0xa   :  { %235 = vmatpush.msra.mxu0 %v112_v8  ;;  %461 = vmatpush.msra.mxu2 %v113_v9  ;;  %v97_v27 = vld [vmem:[%s4081_s1 + $0x38] sm:$0xff]  ;;  %v94_v28 = vld [vmem:[%s4081_s1 + $0x20] sm:$0xff]  ;;  %v95_v29 = vld [vmem:[%s4081_s1 + $0x28] sm:$0xff] }
   0xb   :  { %v128_v30 = vld [vmem:[%s4081_s1 + $0x130] sm:$0xff]  ;;  %v126_v31 = vld [vmem:[%s4081_s1 + $0x120] sm:$0xff]  ;;  %v93_v33 = vld [vmem:[%s4081_s1 + $0x18] sm:$0xff] }
   0xc   :  { %236 = vmatpush.msra.mxu0 %v110_v10  ;;  %462 = vmatpush.msra.mxu2 %v111_v11  ;;  %v92_v32 = vld [vmem:[%s4081_s1 + $0x10] sm:$0xff]  ;;  %v90_v35 = vld [vmem:[%s4081_s1] sm:$0xff]  ;;  %v91_v36 = vld [vmem:[%s4081_s1 + $0x8] sm:$0xff] }
   0xd   :  { %2246 = vmatpush.msra.mxu1 %v128_v30  ;;  %v124_v34 = vld [vmem:[%s4081_s1 + $0x110] sm:$0xff]  ;;  %v26_v37 = vld [vmem:[%s4082_s0] sm:$0xff]  ;;  %v2433_v39 = vld [vmem:[%s4082_s0 + $0x48] sm:$0xff] }
   0xe   :  { %237 = vmatpush.msra.mxu0 %v108_v12  ;;  %463 = vmatpush.msra.mxu2 %v109_v13  ;;  %v122_v38 = vld [vmem:[%s4081_s1 + $0x100] sm:$0xff]  ;;  %v28_v40 = vld [vmem:[%s4082_s0 + $0x10] sm:$0xff]  ;;  %v2443_v41 = vld [vmem:[%s4082_s0 + $0x58] sm:$0xff] }
   0xf   :  { %2247 = vmatpush.msra.mxu1 %v126_v31  ;;  %v30_v42 = vld [vmem:[%s4082_s0 + $0x20] sm:$0xff]  ;;  %v2453_v43 = vld [vmem:[%s4082_s0 + $0x68] sm:$0xff]  ;;  %v32_v44 = vld [vmem:[%s4082_s0 + $0x30] sm:$0xff] }
  0x10   :  { %238 = vmatpush.msra.mxu0 %v106_v15  ;;  %464 = vmatpush.msra.mxu2 %v107_v16  ;;  %v2463_v45 = vld [vmem:[%s4082_s0 + $0x78] sm:$0xff]  ;;  %v34_v46 = vld [vmem:[%s4082_s0 + $0x40] sm:$0xff]  ;;  %v2473_v47 = vld [vmem:[%s4082_s0 + $0x88] sm:$0xff] }
  0x11   :  { %2248 = vmatpush.msra.mxu1 %v124_v34  ;;  %v36_v48 = vld [vmem:[%s4082_s0 + $0x50] sm:$0xff]  ;;  %v2483_v49 = vld [vmem:[%s4082_s0 + $0x98] sm:$0xff]  ;;  %v38_v50 = vld [vmem:[%s4082_s0 + $0x60] sm:$0xff] }
  0x12   :  { %239 = vmatpush.msra.mxu0 %v104_v17  ;;  %465 = vmatpush.msra.mxu2 %v105_v18  ;;  %v2493_v51 = vld [vmem:[%s4082_s0 + $0xa8] sm:$0xff]  ;;  %v40_v52 = vld [vmem:[%s4082_s0 + $0x70] sm:$0xff]  ;;  %v2503_v53 = vld [vmem:[%s4082_s0 + $0xb8] sm:$0xff] }
  0x13   :  { %2249 = vmatpush.msra.mxu1 %v122_v38  ;;  %v42_v54 = vld [vmem:[%s4082_s0 + $0x80] sm:$0xff]  ;;  %v2513_v55 = vld [vmem:[%s4082_s0 + $0xc8] sm:$0xff]  ;;  %v44_v56 = vld [vmem:[%s4082_s0 + $0x90] sm:$0xff] }
  0x14   :  { %240 = vmatpush.msra.mxu0 %v102_v19  ;;  %466 = vmatpush.msra.mxu2 %v103_v20  ;;  %v2523_v57 = vld [vmem:[%s4082_s0 + $0xd8] sm:$0xff]  ;;  %v131_v59 = vld [vmem:[%s4081_s1 + $0x148] sm:$0xff]  ;;  %v46_v61 = vld [vmem:[%s4082_s0 + $0xa0] sm:$0xff] }
  0x15   :  { %1996 = vmatmul.msk.f32.vlgmr.msra.gmra.mxu1 %vm134_vm0, %v2433_v39  ;;  %v133_v58 = vld [vmem:[%s4081_s1 + $0x158] sm:$0xff]  ;;  %v2542_v62 = vld [vmem:[%s4082_s0 + $0xe8] sm:$0xff]  ;;  %v48_v2 = vld [vmem:[%s4082_s0 + $0xb0] sm:$0xff] }
  0x16   :  { %241 = vmatpush.msra.mxu0 %v100_v22  ;;  %467 = vmatpush.msra.mxu2 %v101_v23  ;;  %v129_v60 = vld [vmem:[%s4081_s1 + $0x138] sm:$0xff]  ;;  %v127_v63 = vld [vmem:[%s4081_s1 + $0x128] sm:$0xff]  ;;  %v50_v4 = vld [vmem:[%s4082_s0 + $0xc0] sm:$0xff] }
  0x17   :  { %2250 = vmatpush.msra.mxu3 %v133_v58  ;;  %v125_v0 = vld [vmem:[%s4081_s1 + $0x118] sm:$0xff]  ;;  %v123_v1 = vld [vmem:[%s4081_s1 + $0x108] sm:$0xff]  ;;  %v52_v6 = vld [vmem:[%s4082_s0 + $0xd0] sm:$0xff] }
  0x18   :  { %242 = vmatpush.msra.mxu0 %v98_v24  ;;  %468 = vmatpush.msra.mxu2 %v99_v25  ;;  %v2563_v3 = vld [vmem:[%s4082_s0 + $0xf8] sm:$0xff]  ;;  %v2575_v5 = vld [vmem:[%s4082_s0 + $0x108] sm:$0xff]  ;;  %v54_v8 = vld [vmem:[%s4082_s0 + $0xe0] sm:$0xff] }
  0x19   :  { %2251 = vmatpush.msra.mxu3 %v131_v59  ;;  %v2587_v7 = vld [vmem:[%s4082_s0 + $0x118] sm:$0xff]  ;;  %v2599_v9 = vld [vmem:[%s4082_s0 + $0x128] sm:$0xff]  ;;  %v56_v10 = vld [vmem:[%s4082_s0 + $0xf0] sm:$0xff] }
  0x1a   :  { %243 = vmatpush.msra.mxu0 %v96_v26  ;;  %469 = vmatpush.msra.mxu2 %v97_v27  ;;  %v2611_v11 = vld [vmem:[%s4082_s0 + $0x138] sm:$0xff]  ;;  %v58_v13 = vld [vmem:[%s4082_s0 + $0x100] sm:$0xff]  ;;  %v2625_v15 = vld [vmem:[%s4082_s0 + $0x148] sm:$0xff] }
  0x1b   :  { %2252 = vmatpush.msra.mxu3 %v129_v60  ;;  %v60_v17 = vld [vmem:[%s4082_s0 + $0x110] sm:$0xff]  ;;  %v2639_v19 = vld [vmem:[%s4082_s0 + $0x158] sm:$0xff]  ;;  %v2653_v23 = vld [vmem:[%s4082_s0 + $0x168] sm:$0xff] }
  0x1c   :  { %244 = vmatpush.msra.mxu0 %v94_v28  ;;  %470 = vmatpush.msra.mxu2 %v95_v29  ;;  %v64_v25 = vld [vmem:[%s4082_s0 + $0x130] sm:$0xff]  ;;  %v2669_v28 = vld [vmem:[%s4082_s0 + $0x178] sm:$0xff] }
  0x1d   :  { %1997 = vmatmul.msk.f32.gmra.mxu1 %vm134_vm0, %v2443_v41  ;;  %2253 = vmatpush.msra.mxu3 %v127_v63 }
  0x1e   :  { %245 = vmatpush.msra.mxu0 %v92_v32  ;;  %471 = vmatpush.msra.mxu2 %v93_v33  ;;  %v2681_v32 = vld [vmem:[%s4082_s0 + $0x188] sm:$0xff] }
  0x1f   :  { %2254 = vmatpush.msra.mxu3 %v125_v0 }
  0x20   :  { %246 = vmatpush.msra.mxu0 %v90_v35  ;;  %472 = vmatpush.msra.mxu2 %v91_v36  ;;  %v68_v35 = vld [vmem:[%s4082_s0 + $0x150] sm:$0xff] }
  0x21   :  { %247 = vmatmul.f32.vlgmr.msra.gmra.mxu0 %v26_v37  ;;  %473 = vmatmul.f32.vlgmr.msra.gmra.mxu2 %v26_v37  ;;  %v2697_v37 = vld [vmem:[%s4082_s0 + $0x198] sm:$0xff] }
  0x22   :  { %354 = vmatpush.msrb.mxu0 %v132_v14  ;;  %580 = vmatpush.msrb.mxu2 %v133_v58  ;;  %v2745_v58 = vld [vmem:[%s4082_s0 + $0x1c8] sm:$0xff] }
  0x23   :  { %2255 = vmatpush.msra.mxu3 %v123_v1 }
  0x24   :  { %355 = vmatpush.msrb.mxu0 %v130_v21  ;;  %581 = vmatpush.msrb.mxu2 %v131_v59  ;;  %v62_v21 = vld [vmem:[%s4082_s0 + $0x120] sm:$0xff] }
  0x25   :  { %1998 = vmatmul.msk.f32.gmra.mxu1 %vm134_vm0, %v2453_v43  ;;  %2028 = vmatmul.msk.f32.vlgmr.msra.gmra.mxu3 %vm134_vm0, %v2433_v39 }
  0x26   :  { %356 = vmatpush.msrb.mxu0 %v128_v30  ;;  %582 = vmatpush.msrb.mxu2 %v129_v60  ;;  %v66_v30 = vld [vmem:[%s4082_s0 + $0x140] sm:$0xff]  ;;  %v76_v60 = vld [vmem:[%s4082_s0 + $0x190] sm:$0xff] }
  0x28   :  { %357 = vmatpush.msrb.mxu0 %v126_v31  ;;  %583 = vmatpush.msrb.mxu2 %v127_v63 }
  0x29   :  { %250 = vmatmul.f32.gmra.mxu0 %v28_v40  ;;  %476 = vmatmul.f32.gmra.mxu2 %v28_v40  ;;  %v70_v40 = vld [vmem:[%s4082_s0 + $0x160] sm:$0xff] }
  0x2a   :  { %358 = vmatpush.msrb.mxu0 %v124_v34  ;;  %584 = vmatpush.msrb.mxu2 %v125_v0 }
  0x2c   :  { %359 = vmatpush.msrb.mxu0 %v122_v38  ;;  %585 = vmatpush.msrb.mxu2 %v123_v1  ;;  %v78_v1 = vld [vmem:[%s4082_s0 + $0x1a0] sm:$0xff] }
  0x2d   :  { %1999 = vmatmul.msk.f32.gmra.mxu1 %vm134_vm0, %v2463_v45  ;;  %2029 = vmatmul.msk.f32.gmra.mxu3 %vm134_vm0, %v2443_v41 }
  0x31   :  { %253 = vmatmul.f32.gmra.mxu0 %v30_v42  ;;  %479 = vmatmul.f32.gmra.mxu2 %v30_v42 }
  0x35   :  { %2000 = vmatmul.msk.f32.gmra.mxu1 %vm134_vm0, %v2473_v47  ;;  %2030 = vmatmul.msk.f32.gmra.mxu3 %vm134_vm0, %v2453_v43 }
  0x39   :  { %256 = vmatmul.f32.gmra.mxu0 %v32_v44  ;;  %482 = vmatmul.f32.gmra.mxu2 %v32_v44  ;;  %v2711_v44 = vld [vmem:[%s4082_s0 + $0x1a8] sm:$0xff] }
  0x3d   :  { %2001 = vmatmul.msk.f32.gmra.mxu1 %vm134_vm0, %v2483_v49  ;;  %2031 = vmatmul.msk.f32.gmra.mxu3 %vm134_vm0, %v2463_v45 }
  0x41   :  { %259 = vmatmul.f32.gmra.mxu0 %v34_v46  ;;  %485 = vmatmul.f32.gmra.mxu2 %v34_v46 }
  0x45   :  { %2002 = vmatmul.msk.f32.gmra.mxu1 %vm134_vm0, %v2493_v51  ;;  %2032 = vmatmul.msk.f32.gmra.mxu3 %vm134_vm0, %v2473_v47 }
  0x49   :  { %262 = vmatmul.f32.gmra.mxu0 %v36_v48  ;;  %488 = vmatmul.f32.gmra.mxu2 %v36_v48  ;;  %v72_v48 = vld [vmem:[%s4082_s0 + $0x170] sm:$0xff] }
  0x4d   :  { %2003 = vmatmul.msk.f32.gmra.mxu1 %vm134_vm0, %v2503_v53  ;;  %2033 = vmatmul.msk.f32.gmra.mxu3 %vm134_vm0, %v2483_v49 }
  0x51   :  { %265 = vmatmul.f32.gmra.mxu0 %v38_v50  ;;  %491 = vmatmul.f32.gmra.mxu2 %v38_v50 }
  0x55   :  { %2004 = vmatmul.msk.f32.gmra.mxu1 %vm134_vm0, %v2513_v55  ;;  %2034 = vmatmul.msk.f32.gmra.mxu3 %vm134_vm0, %v2493_v51 }
  0x59   :  { %268 = vmatmul.f32.gmra.mxu0 %v40_v52  ;;  %494 = vmatmul.f32.gmra.mxu2 %v40_v52  ;;  %v2729_v52 = vld [vmem:[%s4082_s0 + $0x1b8] sm:$0xff] }
  0x5d   :  { %2005 = vmatmul.msk.f32.gmra.mxu1 %vm134_vm0, %v2523_v57  ;;  %2035 = vmatmul.msk.f32.gmra.mxu3 %vm134_vm0, %v2503_v53 }
  0x61   :  { %271 = vmatmul.f32.gmra.mxu0 %v42_v54  ;;  %497 = vmatmul.f32.gmra.mxu2 %v42_v54 }
  0x65   :  { %2006 = vmatmul.msk.f32.gmra.mxu1 %vm134_vm0, %v2542_v62  ;;  %2036 = vmatmul.msk.f32.gmra.mxu3 %vm134_vm0, %v2513_v55  ;;  %v74_v55 = vld [vmem:[%s4082_s0 + $0x180] sm:$0xff] }
  0x69   :  { %274 = vmatmul.f32.gmra.mxu0 %v44_v56  ;;  %500 = vmatmul.f32.gmra.mxu2 %v44_v56 }
  0x6d   :  { %2007 = vmatmul.msk.f32.gmra.mxu1 %vm134_vm0, %v2563_v3  ;;  %2037 = vmatmul.msk.f32.gmra.mxu3 %vm134_vm0, %v2523_v57 }
  0x71   :  { %277 = vmatmul.f32.gmra.mxu0 %v46_v61  ;;  %503 = vmatmul.f32.gmra.mxu2 %v46_v61 }
  0x75   :  { %2008 = vmatmul.msk.f32.gmra.mxu1 %vm134_vm0, %v2575_v5  ;;  %2038 = vmatmul.msk.f32.gmra.mxu3 %vm134_vm0, %v2542_v62  ;;  %v2759_v62 = vld [vmem:[%s4082_s0 + $0x1d8] sm:$0xff] }
  0x79   :  { %280 = vmatmul.f32.gmra.mxu0 %v48_v2  ;;  %506 = vmatmul.f32.gmra.mxu2 %v48_v2 }
  0x7d   :  { %2009 = vmatmul.msk.f32.gmra.mxu1 %vm134_vm0, %v2587_v7  ;;  %2039 = vmatmul.msk.f32.gmra.mxu3 %vm134_vm0, %v2563_v3 }
  0x81   :  { %283 = vmatmul.f32.gmra.mxu0 %v50_v4  ;;  %509 = vmatmul.f32.gmra.mxu2 %v50_v4 }
  0x85   :  { %2010 = vmatmul.msk.f32.gmra.mxu1 %vm134_vm0, %v2599_v9  ;;  %2040 = vmatmul.msk.f32.gmra.mxu3 %vm134_vm0, %v2575_v5  ;;  %v2771_v5 = vld [vmem:[%s4082_s0 + $0x1e8] sm:$0xff] }
  0x89   :  { %286 = vmatmul.f32.gmra.mxu0 %v52_v6  ;;  %512 = vmatmul.f32.gmra.mxu2 %v52_v6 }
  0x8d   :  { %2011 = vmatmul.msk.f32.gmra.mxu1 %vm134_vm0, %v2611_v11  ;;  %2041 = vmatmul.msk.f32.gmra.mxu3 %vm134_vm0, %v2587_v7 }
  0x91   :  { %289 = vmatmul.f32.gmra.mxu0 %v54_v8  ;;  %515 = vmatmul.f32.gmra.mxu2 %v54_v8 }
  0x92   :  { %v373_v14 = vpop.f32.mrf.mxu1 }
  0x95   :  { %2012 = vmatmul.msk.f32.gmra.mxu1 %vm134_vm0, %v2625_v15  ;;  %2042 = vmatmul.msk.f32.gmra.mxu3 %vm134_vm0, %v2599_v9  ;;  %v80_v9 = vld [vmem:[%s4082_s0 + $0x1b0] sm:$0xff] }
  0x99   :  { %292 = vmatmul.f32.gmra.mxu0 %v56_v10  ;;  %518 = vmatmul.f32.gmra.mxu2 %v56_v10 }
  0x9a   :  { %v376_v18 = vpop.f32.mrf.mxu1 }
  0x9d   :  { %2013 = vmatmul.msk.f32.gmra.mxu1 %vm134_vm0, %v2639_v19  ;;  %2043 = vmatmul.msk.f32.gmra.mxu3 %vm134_vm0, %v2611_v11 }
  0x9e   :  { %v2615_v12 = vpop.f32.mrf.mxu0 }
  0xa1   :  { %295 = vmatmul.f32.gmra.mxu0 %v58_v13  ;;  %521 = vmatmul.f32.gmra.mxu2 %v58_v13 }
  0xa2   :  { %v379_v22 = vpop.f32.mrf.mxu1 }
  0xa4   :  { %v2662_v26 = vpop.f32.mrf.mxu2 }
  0xa5   :  { %2014 = vmatmul.msk.f32.gmra.mxu1 %vm134_vm0, %v2653_v23  ;;  %2044 = vmatmul.msk.f32.gmra.mxu3 %vm134_vm0, %v2625_v15 }
  0xa6   :  { %v2629_v16 = vpop.f32.mrf.mxu0 }
  0xa9   :  { %298 = vmatmul.f32.gmra.mxu0 %v60_v17  ;;  %524 = vmatmul.f32.gmra.mxu2 %v60_v17 }
  0xaa   :  { %v382_v27 = vpop.f32.mrf.mxu1 }
  0xac   :  { %v2683_v33 = vpop.f32.mrf.mxu2 }
  0xad   :  { %2015 = vmatmul.msk.f32.gmra.mxu1 %vm134_vm0, %v2669_v28  ;;  %2045 = vmatmul.msk.f32.gmra.mxu3 %vm134_vm0, %v2639_v19 }
  0xae   :  { %v2643_v20 = vpop.f32.mrf.mxu0 }
  0xb1   :  { %301 = vmatmul.f32.gmra.mxu0 %v62_v21  ;;  %527 = vmatmul.f32.gmra.mxu2 %v62_v21 }
  0xb2   :  { %v385_v31 = vpop.f32.mrf.mxu1 }
  0xb4   :  { %v2699_v38 = vpop.f32.mrf.mxu2 }
  0xb5   :  { %2016 = vmatmul.msk.f32.gmra.mxu1 %vm134_vm0, %v2681_v32  ;;  %2046 = vmatmul.msk.f32.gmra.mxu3 %vm134_vm0, %v2653_v23 }
  0xb6   :  { %v2657_v24 = vpop.f32.mrf.mxu0 }
  0xb9   :  { %304 = vmatmul.f32.gmra.mxu0 %v64_v25  ;;  %530 = vmatmul.f32.gmra.mxu2 %v64_v25  ;;  %v82_v25 = vld [vmem:[%s4082_s0 + $0x1c0] sm:$0xff] }
  0xba   :  { %v2692_v36 = vpop.f32.mrf.mxu1 }
  0xbc   :  { %v2719_v46 = vpop.f32.mrf.mxu2 }
  0xbd   :  { %2017 = vmatmul.msk.f32.gmra.mxu1 %vm134_vm0, %v2697_v37  ;;  %2047 = vmatmul.msk.f32.gmra.mxu3 %vm134_vm0, %v2669_v28  ;;  %v88_v28 = vld [vmem:[%s4082_s0 + $0x1f0] sm:$0xff] }
  0xbe   :  { %v260_v29 = vpop.f32.mrf.mxu0 }
  0xbf   :  { %v374_v41 = vadd.f32 %v373_v14, %v260_v29  ;;  %v2788_v14 = vld [vmem:[%s4082_s0 + $0x1f8] sm:$0xff] }
  0xc1   :  { %307 = vmatmul.f32.gmra.mxu0 %v66_v30  ;;  %533 = vmatmul.f32.gmra.mxu2 %v66_v30 }
  0xc2   :  { %v391_v43 = vpop.f32.mrf.mxu1 }
  0xc4   :  { %v486_v56 = vpop.f32.mrf.mxu2 }
  0xc5   :  { %2018 = vmatmul.msk.f32.gmra.mxu1 %vm134_vm0, %v2711_v44  ;;  %2048 = vmatmul.msk.f32.gmra.mxu3 %vm134_vm0, %v2681_v32 }
  0xc6   :  { %v263_v34 = vpop.f32.mrf.mxu0 }
  0xc7   :  { %v377_v49 = vadd.f32 %v376_v18, %v263_v34  ;;  %v599_v18 = vpop.f32.mrf.mxu3  ;;  %v84_v34 = vld [vmem:[%s4082_s0 + $0x1d0] sm:$0xff] }
  0xc8   :  { %v2796_v21 = vadd.f32 %v599_v18, %v486_v56 }
  0xc9   :  { %310 = vmatmul.f32.gmra.mxu0 %v68_v35  ;;  %536 = vmatmul.f32.gmra.mxu2 %v68_v35 }
  0xca   :  { %v394_v51 = vpop.f32.mrf.mxu1 }
  0xcc   :  { %v489_v63 = vpop.f32.mrf.mxu2 }
  0xcd   :  { %2019 = vmatmul.msk.f32.gmra.mxu1 %vm134_vm0, %v2729_v52  ;;  %2049 = vmatmul.msk.f32.gmra.mxu3 %vm134_vm0, %v2697_v37 }
  0xce   :  { %v266_v39 = vpop.f32.mrf.mxu0 }
  0xcf   :  { %v380_v42 = vadd.f32 %v379_v22, %v266_v39  ;;  %v602_v29 = vpop.f32.mrf.mxu3 }
  0xd0   :  { %v2803_v30 = vadd.f32 %v602_v29, %v489_v63 }
  0xd1   :  { %v2713_v45 = vmax.f32 %v374_v41, %v380_v42  ;;  %313 = vmatmul.f32.gmra.mxu0 %v70_v40  ;;  %539 = vmatmul.f32.gmra.mxu2 %v70_v40  ;;  %v86_v42 = vld [vmem:[%s4082_s0 + $0x1e0] sm:$0xff] }
  0xd2   :  { %v397_v57 = vpop.f32.mrf.mxu1 }
  0xd3   :  { %4099 = vst [vmem:[#allocation3_spill] sm:$0xff] %v2713_v45  ;;  %720 = vrot.lane.b32.xlu1 %v2713_v45, %s2270_s18 }
  0xd4   :  { %v492_v7 = vpop.f32.mrf.mxu2 }
  0xd5   :  { %2020 = vmatmul.msk.f32.gmra.mxu1 %vm134_vm0, %v2745_v58  ;;  %2050 = vmatmul.msk.f32.gmra.mxu3 %vm134_vm0, %v2711_v44 }
  0xd6   :  { %v269_v47 = vpop.f32.mrf.mxu0 }
  0xd7   :  { %v383_v50 = vadd.f32 %v382_v27, %v269_v47  ;;  %v605_v19 = vpop.f32.mrf.mxu3 }
  0xd8   :  { %v2812_v39 = vadd.f32 %v605_v19, %v492_v7 }
  0xd9   :  { %v2731_v53 = vmax.f32 %v377_v49, %v383_v50  ;;  %316 = vmatmul.f32.gmra.mxu0 %v72_v48  ;;  %542 = vmatmul.f32.gmra.mxu2 %v72_v48 }
  0xda   :  { %v2754_v61 = vpop.f32.mrf.mxu1 }
  0xdb   :  { %4100 = vst [vmem:[#allocation4_spill] sm:$0xff] %v2731_v53  ;;  %722 = vrot.lane.b32.xlu1 %v2731_v53, %s2270_s18 }
  0xdc   :  { %v495_v15 = vpop.f32.mrf.mxu2 }
  0xdd   :  { %2021 = vmatmul.msk.f32.gmra.mxu1 %vm134_vm0, %v2759_v62  ;;  %2051 = vmatmul.msk.f32.gmra.mxu3 %vm134_vm0, %v2729_v52 }
  0xde   :  { %v272_v54 = vpop.f32.mrf.mxu0 }
  0xdf   :  { %v386_v2 = vadd.f32 %v385_v31, %v272_v54  ;;  %v608_v50 = vpop.f32.mrf.mxu3 }
  0xe1   :  { %319 = vmatmul.f32.gmra.mxu0 %v74_v55  ;;  %545 = vmatmul.f32.gmra.mxu2 %v74_v55 }
  0xe2   :  { %v403_v4 = vpop.f32.mrf.mxu1 }
  0xe4   :  { %v498_v35 = vpop.f32.mrf.mxu2 }
  0xe5   :  { %2022 = vmatmul.msk.f32.gmra.mxu1 %vm134_vm0, %v2771_v5  ;;  %2052 = vmatmul.msk.f32.gmra.mxu3 %vm134_vm0, %v2745_v58 }
  0xe6   :  { %v275_v59 = vpop.f32.mrf.mxu0 }
  0xe7   :  { %v389_v10 = vadd.f32 %v2692_v36, %v275_v59 }
  0xe9   :  { %322 = vmatmul.f32.gmra.mxu0 %v76_v60  ;;  %548 = vmatmul.f32.gmra.mxu2 %v76_v60  ;;  %v611_v60 = vpop.f32.mrf.mxu3 }
  0xea   :  { %v406_v13 = vpop.f32.mrf.mxu1  ;;  %v612_v37 = vadd.f32 %v611_v60, %v498_v35 }
  0xec   :  { %v501_v23 = vpop.f32.mrf.mxu2 }
  0xed   :  { %2023 = vmatmul.msk.f32.gmra.mxu1 %vm134_vm0, %v2788_v14  ;;  %2053 = vmatmul.msk.f32.gmra.mxu3 %vm134_vm0, %v2759_v62 }
  0xee   :  { %v278_v0 = vpop.f32.mrf.mxu0 }
  0xef   :  { %v392_v3 = vadd.f32 %v391_v43, %v278_v0 }
  0xf1   :  { %v2773_v6 = vmax.f32 %v386_v2, %v392_v3  ;;  %325 = vmatmul.f32.gmra.mxu0 %v78_v1  ;;  %551 = vmatmul.f32.gmra.mxu2 %v78_v1  ;;  %v27_v2 = vld [vmem:[%s4082_s0 + $0x8] sm:$0xff]  ;;  %v614_v32 = vpop.f32.mrf.mxu3 }
  0xf2   :  { %v409_v27 = vpop.f32.mrf.mxu1  ;;  %v615_v29 = vadd.f32 %v614_v32, %v501_v23 }
  0xf3   :  { %4101 = vst [vmem:[#allocation5_spill] sm:$0xff] %v2773_v6  ;;  %724 = vrot.lane.b32.xlu2 %v2773_v6, %s2270_s18 }
  0xf4   :  { %v504_v63 = vpop.f32.mrf.mxu2 }
  0xf5   :  { %2054 = vmatmul.msk.f32.gmra.mxu3 %vm134_vm0, %v2771_v5 }
  0xf6   :  { %v281_v8 = vpop.f32.mrf.mxu0 }
  0xf7   :  { %v395_v11 = vadd.f32 %v394_v51, %v281_v8  ;;  %v2825_v51 = vadd.f32 %v608_v50, %v495_v15 }
  0xf9   :  { %v2790_v17 = vmax.f32 %v389_v10, %v395_v11  ;;  %328 = vmatmul.f32.gmra.mxu0 %v80_v9  ;;  %554 = vmatmul.f32.gmra.mxu2 %v80_v9  ;;  %v617_v8 = vpop.f32.mrf.mxu3 }
  0xfa   :  { %v2810_v36 = vpop.f32.mrf.mxu1  ;;  %v618_v9 = vadd.f32 %v617_v8, %v504_v63 }
  0xfb   :  { %726 = vrot.lane.b32.xlu2 %v2790_v17, %s2270_s18 }
  0xfc   :  { %v692_v10 = vmax.f32 %v612_v37, %v618_v9 }
  0xfd   :  { %2055 = vmatmul.msk.f32.gmra.mxu3 %vm134_vm0, %v2788_v14 }
  0xfe   :  { %v284_v22 = vpop.f32.mrf.mxu0 }
  0xff   :  { %v398_v43 = vadd.f32 %v397_v57, %v284_v22 }
 0x101   :  { %331 = vmatmul.f32.gmra.mxu0 %v82_v25  ;;  %557 = vmatmul.f32.gmra.mxu2 %v82_v25 }
 0x102   :  { %v415_v49 = vpop.f32.mrf.mxu1 }
 0x106   :  { %v287_v31 = vpop.f32.mrf.mxu0 }
 0x107   :  { %v401_v56 = vadd.f32 %v2754_v61, %v287_v31  ;;  %v507_v61 = vpop.f32.mrf.mxu2  ;;  %v620_v31 = vpop.f32.mrf.mxu3 }
 0x109   :  { %334 = vmatmul.f32.gmra.mxu0 %v84_v34  ;;  %560 = vmatmul.f32.gmra.mxu2 %v84_v34  ;;  %v621_v34 = vadd.f32 %v620_v31, %v507_v61 }
 0x10a   :  { %v418_v0 = vpop.f32.mrf.mxu1 }
 0x10b   :  { %v694_v35 = vmax.f32 %v615_v29, %v621_v34 }
 0x10e   :  { %v290_v41 = vpop.f32.mrf.mxu0 }
 0x10f   :  { %v404_v47 = vadd.f32 %v403_v4, %v290_v41  ;;  %v29_v4 = vld [vmem:[%s4082_s0 + $0x18] sm:$0xff]  ;;  %v2856_v18 = vpop.f32.mrf.mxu2  ;;  %v2878_v23 = vpop.f32.mrf.mxu3 }
 0x111   :  { %v2821_v48 = vmax.f32 %v398_v43, %v404_v47  ;;  %337 = vmatmul.f32.gmra.mxu0 %v86_v42  ;;  %563 = vmatmul.f32.gmra.mxu2 %v86_v42 }
 0x112   :  { %v421_v7 = vpop.f32.mrf.mxu1 }
 0x113   :  { %728 = vrot.lane.b32.xlu2 %v2821_v48, %s2270_s18 }
 0x116   :  { %v293_v55 = vpop.f32.mrf.mxu0 }
 0x117   :  { %v407_v57 = vadd.f32 %v406_v13, %v293_v55  ;;  %v31_v13 = vld [vmem:[%s4082_s0 + $0x28] sm:$0xff]  ;;  %v2872_v42 = vpop.f32.mrf.mxu2 }
 0x119   :  { %v2835_v59 = vmax.f32 %v401_v56, %v407_v57  ;;  %340 = vmatmul.f32.gmra.mxu0 %v88_v28  ;;  %566 = vmatmul.f32.gmra.mxu2 %v88_v28 }
 0x11a   :  { %v424_v44 = vpop.f32.mrf.mxu1 }
 0x11b   :  { %730 = vrot.lane.b32.xlu2 %v2835_v59, %s2270_s18 }
 0x11e   :  { %v296_v1 = vpop.f32.mrf.mxu0 }
 0x11f   :  { %v410_v15 = vadd.f32 %v409_v27, %v296_v1  ;;  %v33_v27 = vld [vmem:[%s4082_s0 + $0x38] sm:$0xff]  ;;  %v2886_v58 = vpop.f32.mrf.mxu2  ;;  %s2271_s0 = smov 32  }
 0x121   :  { %1992 = vmatmul.msk.f32.vlgmr.msrb.gmra.mxu0 %vm134_vm0, %v27_v2  ;;  %2024 = vmatmul.msk.f32.vlgmr.msrb.gmra.mxu2 %vm134_vm0, %v27_v2 }
 0x122   :  { %v427_v47 = vpop.f32.mrf.mxu1 }
 0x126   :  { %v299_v3 = vpop.f32.mrf.mxu0 }
 0x127   :  { %v413_v52 = vadd.f32 %v2810_v36, %v299_v3  ;;  %v2884_v36 = vpop.f32.mrf.mxu3  ;;  %v2892_v56 = vpop.f32.mrf.mxu2 }
 0x129   :  { %1993 = vmatmul.msk.f32.gmra.mxu0 %vm134_vm0, %v29_v4  ;;  %2025 = vmatmul.msk.f32.gmra.mxu2 %vm134_vm0, %v29_v4 }
 0x12a   :  { %v430_v50 = vpop.f32.mrf.mxu1 }
 0x12e   :  { %v302_v11 = vpop.f32.mrf.mxu0 }
 0x12f   :  { %v416_v22 = vadd.f32 %v415_v49, %v302_v11  ;;  %v2890_v28 = vpop.f32.mrf.mxu3  ;;  %v2908_v4 = vpop.f32.mrf.mxu2 }
 0x131   :  { %v2860_v25 = vmax.f32 %v410_v15, %v416_v22  ;;  %1994 = vmatmul.msk.f32.gmra.mxu0 %vm134_vm0, %v31_v13  ;;  %2026 = vmatmul.msk.f32.gmra.mxu2 %vm134_vm0, %v31_v13 }
 0x132   :  { %v433_v63 = vpop.f32.mrf.mxu1 }
 0x133   :  { %732 = vrot.lane.b32.xlu2 %v2860_v25, %s2270_s18 }
 0x136   :  { %v305_v19 = vpop.f32.mrf.mxu0 }
 0x137   :  { %v419_v41 = vadd.f32 %v418_v0, %v305_v19  ;;  %v2901_v32 = vpop.f32.mrf.mxu3  ;;  %v2916_v11 = vpop.f32.mrf.mxu2 }
 0x139   :  { %v2874_v43 = vmax.f32 %v413_v52, %v419_v41  ;;  %1995 = vmatmul.msk.f32.gmra.mxu0 %vm134_vm0, %v33_v27  ;;  %2027 = vmatmul.msk.f32.gmra.mxu2 %vm134_vm0, %v33_v27 }
 0x13a   :  { %v436_v8 = vpop.f32.mrf.mxu1 }
 0x13b   :  { %734 = vrot.lane.b32.xlu2 %v2874_v43, %s2270_s18 }
 0x13e   :  { %v308_v49 = vpop.f32.mrf.mxu0 }
 0x13f   :  { %v422_v62 = vadd.f32 %v421_v7, %v308_v49  ;;  %v2912_v14 = vpop.f32.mrf.mxu3  ;;  %v2922_v31 = vpop.f32.mrf.mxu2 }
 0x142   :  { %v439_v13 = vpop.f32.mrf.mxu1 }
 0x146   :  { %v311_v55 = vpop.f32.mrf.mxu0 }
 0x147   :  { %v425_v37 = vadd.f32 %v424_v44, %v311_v55  ;;  %v2918_v15 = vpop.f32.mrf.mxu3  ;;  %v2930_v41 = vpop.f32.mrf.mxu2 }
 0x14a   :  { %v442_v44 = vpop.f32.mrf.mxu1 }
 0x14d   :  { %v725_v57 = vpop.permute.xlu2 %724 }
 0x14e   :  { %v314_v60 = vpop.f32.mrf.mxu0  ;;  %v2895_v0 = vsel %vm715_vm1, %v725_v57, %v692_v10 }
 0x14f   :  { %v428_v1 = vadd.f32 %v427_v47, %v314_v60  ;;  %v2920_v29 = vpop.f32.mrf.mxu3 }
 0x151   :  { %v2899_v2 = vmax.f32 %v422_v62, %v428_v1  ;;  %v2938_v62 = vpop.f32.mrf.mxu2 }
 0x152   :  { %v445_v49 = vpop.f32.mrf.mxu1 }
 0x153   :  { %736 = vrot.lane.b32.xlu2 %v2899_v2, %s2270_s18 }
 0x155   :  { %v727_v5 = vpop.permute.xlu2 %726 }
 0x156   :  { %v317_v61 = vpop.f32.mrf.mxu0  ;;  %v2906_v3 = vsel %vm715_vm1, %v727_v5, %v694_v35 }
 0x157   :  { %v431_v7 = vadd.f32 %v430_v50, %v317_v61  ;;  %v2928_v52 = vpop.f32.mrf.mxu3 }
 0x159   :  { %v2910_v9 = vmax.f32 %v425_v37, %v431_v7  ;;  %v2942_v37 = vpop.f32.mrf.mxu2 }
 0x15a   :  { %v448_v1 = vpop.f32.mrf.mxu1 }
 0x15b   :  { %4102 = vst [vmem:[#allocation6_spill] sm:$0xff] %v2910_v9  ;;  %738 = vrot.lane.b32.xlu2 %v2910_v9, %s2270_s18 }
 0x15e   :  { %v320_v10 = vpop.f32.mrf.mxu0 }
 0x15f   :  { %v434_v35 = vadd.f32 %v433_v63, %v320_v10  ;;  %v2936_v60 = vpop.f32.mrf.mxu3 }
 0x160   :  { %4104 = vst [vmem:[#allocation8_spill] sm:$0xff] %v2936_v60 }
 0x162   :  { %v451_v7 = vpop.f32.mrf.mxu1 }
 0x166   :  { %v323_v22 = vpop.f32.mrf.mxu0 }
 0x167   :  { %v437_v50 = vadd.f32 %v436_v8, %v323_v22  ;;  %v2940_v61 = vpop.f32.mrf.mxu3 }
 0x16e   :  { %v326_v34 = vpop.f32.mrf.mxu0 }
 0x16f   :  { %v440_v19 = vadd.f32 %v439_v13, %v326_v34  ;;  %v2948_v34 = vpop.f32.mrf.mxu2 }
 0x170   :  { %4106 = vst [vmem:[#allocation10_spill] sm:$0xff] %v2948_v34 }
 0x171   :  { %v2924_v27 = vmax.f32 %v434_v35, %v440_v19  ;;  %v454_v35 = vpop.f32.mrf.mxu1 }
 0x173   :  { %4103 = vst [vmem:[#allocation7_spill] sm:$0xff] %v2924_v27  ;;  %740 = vrot.lane.b32.xlu2 %v2924_v27, %s2270_s18 }
 0x176   :  { %v329_v47 = vpop.f32.mrf.mxu0 }
 0x177   :  { %v443_v55 = vadd.f32 %v442_v44, %v329_v47  ;;  %v2946_v44 = vpop.f32.mrf.mxu3  ;;  %v2952_v47 = vpop.permute.xlu2 %728 }
 0x178   :  { %4105 = vst [vmem:[#allocation9_spill] sm:$0xff] %v2946_v44 }
 0x179   :  { %v2932_v57 = vmax.f32 %v437_v50, %v443_v55 }
 0x17b   :  { %742 = vrot.lane.b32.xlu2 %v2932_v57, %s2270_s18 }
 0x17e   :  { %v332_v63 = vpop.f32.mrf.mxu0 }
 0x17f   :  { %v446_v8 = vadd.f32 %v445_v49, %v332_v63  ;;  %v2958_v49 = vpop.f32.mrf.mxu3  ;;  %v2960_v63 = vpop.f32.mrf.mxu2 }
 0x186   :  { %v335_v5 = vpop.f32.mrf.mxu0 }
 0x187   :  { %v449_v50 = vadd.f32 %v448_v1, %v335_v5  ;;  %v2078_v1 = vld [vmem:[%s4083_s3 + $0x170] sm:$0xff]  ;;  %v659_v5 = vpop.f32.mrf.mxu3 }
 0x188   :  { %1101 = vmatpush.msrb.mxu1 %v2078_v1 }
 0x18e   :  { %v338_v10 = vpop.f32.mrf.mxu0 }
 0x18f   :  { %v452_v13 = vadd.f32 %v451_v7, %v338_v10  ;;  %v2962_v10 = vpop.permute.xlu2 %730  ;;  %v2973_v40 = vpop.f32.mrf.mxu3 }
 0x190   :  { %4108 = vst [vmem:[#allocation12_spill] sm:$0xff] %v2973_v40 }
 0x191   :  { %v2944_v22 = vmax.f32 %v446_v8, %v452_v13  ;;  %v546_v13 = vpop.f32.mrf.mxu2 }
 0x193   :  { %744 = vrot.lane.b32.xlu2 %v2944_v22, %s2270_s18 }
 0x196   :  { %v341_v19 = vpop.f32.mrf.mxu0 }
 0x197   :  { %v455_v55 = vadd.f32 %v454_v35, %v341_v19  ;;  %v2969_v35 = vpop.permute.xlu2 %732 }
 0x199   :  { %v2954_v54 = vmax.f32 %v449_v50, %v455_v55 }
 0x19b   :  { %4107 = vst [vmem:[#allocation11_spill] sm:$0xff] %v2954_v54  ;;  %746 = vrot.lane.b32.xlu2 %v2954_v54, %s2270_s18  ;;  %v2975_v54 = vpop.f32.mrf.mxu2 }
 0x19e   :  { %v361_v7 = vpop.f32.mrf.mxu0 }
 0x19f   :  { %v362_v50 = vadd.f32 %v361_v7, %v2615_v12  ;;  %v2979_v27 = vpop.permute.xlu2 %734  ;;  %v665_v12 = vpop.f32.mrf.mxu3 }
 0x1a3   :  { %840 = vrot.lane.b32.xlu2 %v2910_v9, %s2271_s0 }
 0x1a6   :  { %v364_v8 = vpop.f32.mrf.mxu0 }
 0x1a7   :  { %v365_v44 = vadd.f32 %v364_v8, %v2629_v16  ;;  %v2996_v16 = vpop.f32.mrf.mxu3 }
 0x1ad   :  { %v2987_v7 = vpop.permute.xlu2 %736 }
 0x1ae   :  { %v367_v19 = vpop.f32.mrf.mxu0 }
 0x1af   :  { %v368_v55 = vadd.f32 %v367_v19, %v2643_v20  ;;  %v552_v20 = vpop.f32.mrf.mxu2  ;;  %v2076_v19 = vld [vmem:[%s4083_s3 + $0x160] sm:$0xff] }
 0x1b0   :  { %1102 = vmatpush.msrb.mxu1 %v2076_v19  ;;  %v666_v8 = vadd.f32 %v665_v12, %v552_v20  ;;  %v2074_v19 = vld [vmem:[%s4083_s3 + $0x150] sm:$0xff]  ;;  %v2072_v12 = vld [vmem:[%s4083_s3 + $0x140] sm:$0xff] }
 0x1b1   :  { %v2977_v9 = vmax.f32 %v362_v50, %v368_v55 }
 0x1b2   :  { %1103 = vmatpush.msrb.mxu1 %v2074_v19 }
 0x1b3   :  { %4109 = vst [vmem:[#allocation13_spill] sm:$0xff] %v2977_v9  ;;  %716 = vrot.lane.b32.xlu0 %v2977_v9, %s2270_s18 }
 0x1b4   :  { %1104 = vmatpush.msrb.mxu1 %v2072_v12  ;;  %v2070_v12 = vld [vmem:[%s4083_s3 + $0x130] sm:$0xff] }
 0x1b6   :  { %v370_v1 = vpop.f32.mrf.mxu0  ;;  %1105 = vmatpush.msrb.mxu1 %v2070_v12 }
 0x1b7   :  { %v371_v34 = vadd.f32 %v370_v1, %v2657_v24  ;;  %v2998_v24 = vpop.f32.mrf.mxu2  ;;  %v671_v1 = vpop.f32.mrf.mxu3 }
 0x1b9   :  { %v2985_v60 = vmax.f32 %v365_v44, %v371_v34  ;;  %v739_v44 = vpop.permute.xlu2 %738  ;;  %v660_v34 = vadd.f32 %v659_v5, %v546_v13 }
 0x1bb   :  { %4110 = vst [vmem:[#allocation14_spill] sm:$0xff] %v2985_v60  ;;  %718 = vrot.lane.b32.xlu0 %v2985_v60, %s2270_s18  ;;  %v708_v50 = vmax.f32 %v660_v34, %v666_v8 }
 0x1bf   :  { %v674_v5 = vpop.f32.mrf.mxu3 }
 0x1c3   :  { %796 = vrot.lane.b32.xlu0 %v2977_v9, %s2271_s0  ;;  %v558_v9 = vpop.f32.mrf.mxu2 }
 0x1c7   :  { %v677_v20 = vpop.f32.mrf.mxu3 }
 0x1cb   :  { %800 = vrot.lane.b32.xlu0 %v2985_v60, %s2271_s0  ;;  %v561_v13 = vpop.f32.mrf.mxu2 }
 0x1cc   :  { %v675_v19 = vadd.f32 %v674_v5, %v561_v13 }
 0x1cd   :  { %v741_v55 = vpop.permute.xlu2 %740 }
 0x1ce   :  { %v760_v40 = vsel %vm715_vm1, %v741_v55, %v708_v50 }
 0x1cf   :  { %846 = vrot.lane.b32.xlu2 %v760_v40, %s2271_s0  ;;  %v680_v8 = vpop.f32.mrf.mxu3 }
 0x1d3   :  { %804 = vrot.lane.b32.xlu0 %v2713_v45, %s2271_s0  ;;  %v564_v34 = vpop.f32.mrf.mxu2 }
 0x1d4   :  { %v678_v12 = vadd.f32 %v677_v20, %v564_v34 }
 0x1d5   :  { %v3018_v40 = vpop.permute.xlu2 %742 }
 0x1d7   :  { %852 = vrot.lane.b32.xlu2 %v2944_v22, %s2271_s0 }
 0x1db   :  { %808 = vrot.lane.b32.xlu0 %v2731_v53, %s2271_s0  ;;  %v567_v50 = vpop.f32.mrf.mxu2 }
 0x1dc   :  { %v681_v53 = vadd.f32 %v680_v8, %v567_v50  ;;  %v2066_v50 = vld [vmem:[%s4083_s3 + $0x110] sm:$0xff] }
 0x1de   :  { %v714_v45 = vmax.f32 %v675_v19, %v681_v53  ;;  %v2068_v53 = vld [vmem:[%s4083_s3 + $0x120] sm:$0xff] }
 0x1df   :  { %1106 = vmatpush.msrb.mxu1 %v2068_v53 }
 0x1e1   :  { %1107 = vmatpush.msrb.mxu1 %v2066_v50 }
 0x1e3   :  { %812 = vrot.lane.b32.xlu0 %v2773_v6, %s2271_s0  ;;  %v587_v5 = vpop.f32.mrf.mxu2 }
 0x1eb   :  { %816 = vrot.lane.b32.xlu0 %v2790_v17, %s2271_s0  ;;  %v590_v13 = vpop.f32.mrf.mxu2 }
 0x1ed   :  { %v745_v55 = vpop.permute.xlu2 %744 }
 0x1f3   :  { %820 = vrot.lane.b32.xlu0 %v2821_v48, %s2271_s0 }
 0x1f5   :  { %v747_v6 = vpop.permute.xlu2 %746 }
 0x1f6   :  { %v763_v60 = vsel %vm715_vm1, %v747_v6, %v714_v45  ;;  %v651_v45 = vadd.f32 %v2940_v61, %v2942_v37  ;;  %v657_v6 = vadd.f32 %v2958_v49, %v2960_v63  ;;  %v593_v61 = vpop.f32.mrf.mxu2  ;;  %v588_v49 = vadd.f32 %v587_v5, %v2662_v26  ;;  %v2064_v26 = vld [vmem:[%s4083_s3 + $0x100] sm:$0xff] }
 0x1f7   :  { %858 = vrot.lane.b32.xlu2 %v763_v60, %s2271_s0  ;;  %v2079_v60 = vld [vmem:[%s4083_s3 + $0x178] sm:$0xff]  ;;  %v594_v37 = vadd.f32 %v593_v61, %v2699_v38  ;;  %v672_v63 = vadd.f32 %v671_v1, %v558_v9  ;;  %1108 = vmatpush.msrb.mxu1 %v2064_v26  ;;  %v591_v9 = vadd.f32 %v590_v13, %v2683_v33 }
 0x1f8   :  { %v706_v8 = vmax.f32 %v651_v45, %v657_v6  ;;  %1166 = vmatpush.msrb.mxu3 %v2079_v60  ;;  %v2075_v33 = vld [vmem:[%s4083_s3 + $0x158] sm:$0xff]  ;;  %v645_v26 = vadd.f32 %v2928_v52, %v2930_v41  ;;  %v996_v52 = vld [vmem:[%s4083_s3 + $0x60] sm:$0xff]  ;;  %v997_v41 = vld [vmem:[%s4083_s3 + $0x68] sm:$0xff] }
 0x1f9   :  { %v684_v53 = vmax.f32 %v588_v49, %v594_v37  ;;  %v712_v60 = vmax.f32 %v672_v63, %v678_v12  ;;  %v2062_v37 = vld [vmem:[%s4083_s3 + $0xf0] sm:$0xff]  ;;  %v4112_v49 = vmax.f32 %v2803_v30, %v2825_v51  ;;  %v2073_v12 = vld [vmem:[%s4083_s3 + $0x148] sm:$0xff]  ;;  %v630_v30 = vadd.f32 %v2890_v28, %v2886_v58  ;;  %v2060_v51 = vld [vmem:[%s4083_s3 + $0xe0] sm:$0xff] }
 0x1fa   :  { %v759_v19 = vsel %vm715_vm1, %v739_v44, %v706_v8  ;;  %v2077_v44 = vld [vmem:[%s4083_s3 + $0x168] sm:$0xff]  ;;  %v721_v8 = vpop.permute.xlu1 %720  ;;  %1109 = vmatpush.msrb.mxu1 %v2062_v37 }
 0x1fb   :  { %824 = vrot.lane.b32.xlu0 %v2835_v59, %s2271_s0  ;;  %1167 = vmatpush.msrb.mxu3 %v2077_v44  ;;  %v762_v1 = vsel %vm715_vm1, %v745_v55, %v712_v60  ;;  %v642_v60 = vadd.f32 %v2920_v29, %v2922_v31  ;;  %v1005_v29 = vld [vmem:[%s4083_s3 + $0xa8] sm:$0xff]  ;;  %v639_v44 = vadd.f32 %v2918_v15, %v2916_v11  ;;  %v998_v11 = vld [vmem:[%s4083_s3 + $0x70] sm:$0xff]  ;;  %v999_v15 = vld [vmem:[%s4083_s3 + $0x78] sm:$0xff] }
 0x1fc   :  { %1110 = vmatpush.msrb.mxu1 %v2060_v51  ;;  %v989_v51 = vld [vmem:[%s4083_s3 + $0x28] sm:$0xff] }
 0x1fd   :  { %1168 = vmatpush.msrb.mxu3 %v2075_v33  ;;  %v4115_v33 = vld [vmem:[#allocation9_spill] sm:$0xff] }
 0x1fe   :  { %v596_v45 = vpop.f32.mrf.mxu2 }
 0x1ff   :  { %v597_v38 = vadd.f32 %v596_v45, %v2719_v46  ;;  %v4111_v46 = vmax.f32 %v2796_v21, %v2812_v39  ;;  %1169 = vmatpush.msrb.mxu3 %v2073_v12  ;;  %v2272_v12 = vmov 0.0  }
 0x200   :  { %946 = vst.msk [vmem:[#allocation2] sm:$0xff] %vm945_vm2, %v2272_v12 }
 0x201   :  { %v686_v20 = vmax.f32 %v591_v9, %v597_v38  ;;  %v750_v61 = vsel %vm715_vm1, %v721_v8, %v4111_v46  ;;  %v1000_v9 = vld [vmem:[%s4083_s3 + $0x80] sm:$0xff]  ;;  %v4113_v8 = vld [vmem:[#allocation8_spill] sm:$0xff]  ;;  %947 = vst.msk [vmem:[#allocation2 + $0x8] sm:$0xff] %vm945_vm2, %v2272_v12 }
 0x202   :  { %v723_v55 = vpop.permute.xlu1 %722  ;;  %v648_v46 = vadd.f32 %v4113_v8, %v2938_v62  ;;  %v990_v62 = vld [vmem:[%s4083_s3 + $0x30] sm:$0xff]  ;;  %949 = vst.msk [vmem:[#allocation2 + $0x90] sm:$0xff] %vm945_vm2, %v2272_v12 }
 0x203   :  { %828 = vrot.lane.b32.xlu0 %v2860_v25, %s2271_s0  ;;  %v751_v21 = vsel %vm715_vm1, %v723_v55, %v4112_v49  ;;  %v992_v49 = vld [vmem:[%s4083_s3 + $0x40] sm:$0xff]  ;;  %950 = vst.msk [vmem:[#allocation2 + $0x98] sm:$0xff] %vm945_vm2, %v2272_v12 }
 0x20b   :  { %832 = vrot.lane.b32.xlu0 %v2874_v43, %s2271_s0 }
 0x213   :  { %836 = vrot.lane.b32.xlu0 %v2899_v2, %s2271_s0 }
 0x21b   :  { %842 = vrot.lane.b32.xlu0 %v759_v19, %s2271_s0 }
 0x223   :  { %848 = vrot.lane.b32.xlu0 %v2932_v57, %s2271_s0 }
 0x225   :  { %v717_v6 = vpop.permute.xlu0 %716 }
 0x226   :  { %v748_v50 = vsel %vm715_vm1, %v717_v6, %v684_v53  ;;  %v624_v53 = vadd.f32 %v2878_v23, %v2856_v18  ;;  %v627_v6 = vadd.f32 %v2884_v36, %v2872_v42  ;;  %v633_v18 = vadd.f32 %v2901_v32, %v2892_v56  ;;  %v2071_v36 = vld [vmem:[%s4083_s3 + $0x138] sm:$0xff]  ;;  %v1006_v56 = vld [vmem:[%s4083_s3 + $0xb0] sm:$0xff] }
 0x227   :  { %798 = vrot.lane.b32.xlu1 %v748_v50, %s2271_s0  ;;  %v1007_v32 = vld [vmem:[%s4083_s3 + $0xb8] sm:$0xff]  ;;  %1170 = vmatpush.msrb.mxu3 %v2071_v36 }
 0x228   :  { %v698_v58 = vmax.f32 %v627_v6, %v633_v18  ;;  %1279 = vmatpush.msra.mxu0 %v1006_v56  ;;  %1344 = vmatpush.msra.mxu2 %v1007_v32  ;;  %v1003_v50 = vld [vmem:[%s4083_s3 + $0x98] sm:$0xff]  ;;  %v2069_v6 = vld [vmem:[%s4083_s3 + $0x128] sm:$0xff]  ;;  %v986_v18 = vld [vmem:[%s4083_s3 + $0x10] sm:$0xff] }
 0x229   :  { %1171 = vmatpush.msrb.mxu3 %v2069_v6  ;;  %v2067_v56 = vld [vmem:[%s4083_s3 + $0x118] sm:$0xff]  ;;  %v4116_v32 = vld [vmem:[#allocation12_spill] sm:$0xff] }
 0x22a   :  { %v755_v42 = vsel %vm715_vm1, %v2962_v10, %v698_v58  ;;  %1345 = vmatpush.msra.mxu2 %v1005_v29  ;;  %v1002_v10 = vld [vmem:[%s4083_s3 + $0x90] sm:$0xff]  ;;  %v4117_v29 = vld [vmem:[#allocation7_spill] sm:$0xff] }
 0x22b   :  { %854 = vrot.lane.b32.xlu0 %v762_v1, %s2271_s0  ;;  %v1001_v1 = vld [vmem:[%s4083_s3 + $0x88] sm:$0xff]  ;;  %1172 = vmatpush.msrb.mxu3 %v2067_v56 }
 0x22c   :  { %1346 = vmatpush.msra.mxu2 %v1003_v50  ;;  %v2063_v50 = vld [vmem:[%s4083_s3 + $0xf8] sm:$0xff] }
 0x22d   :  { %v719_v34 = vpop.permute.xlu0 %718 }
 0x22e   :  { %v749_v5 = vsel %vm715_vm1, %v719_v34, %v686_v20  ;;  %1347 = vmatpush.msra.mxu2 %v1001_v1  ;;  %v994_v34 = vld [vmem:[%s4083_s3 + $0x50] sm:$0xff]  ;;  %v841_v1 = vpop.permute.xlu2 %840 }
 0x22f   :  { %802 = vrot.lane.b32.xlu1 %v749_v5, %s2271_s0  ;;  %v995_v5 = vld [vmem:[%s4083_s3 + $0x58] sm:$0xff] }
 0x230   :  { %1348 = vmatpush.msra.mxu2 %v999_v15 }
 0x232   :  { %1349 = vmatpush.msra.mxu2 %v997_v41 }
 0x234   :  { %1350 = vmatpush.msra.mxu2 %v995_v5 }
 0x235   :  { %v3070_v19 = vpop.permute.xlu0 %796 }
 0x236   :  { %v3285_v5 = vpop.permute.xlu2 %846 }
 0x237   :  { %806 = vrot.lane.b32.xlu1 %v750_v61, %s2271_s0  ;;  %v4114_v61 = vld [vmem:[#allocation10_spill] sm:$0xff] }
 0x238   :  { %v654_v55 = vadd.f32 %v4115_v33, %v4114_v61  ;;  %v2164_v33 = vld [vmem:[%s4083_s3 + $0x220] sm:$0xff] }
 0x23d   :  { %v3080_v13 = vpop.permute.xlu0 %800 }
 0x23f   :  { %810 = vrot.lane.b32.xlu1 %v751_v21, %s2271_s0  ;;  %v993_v21 = vld [vmem:[%s4083_s3 + $0x48] sm:$0xff] }
 0x240   :  { %1351 = vmatpush.msra.mxu2 %v993_v21  ;;  %v853_v21 = vpop.permute.xlu2 %852 }
 0x245   :  { %v3090_v39 = vpop.permute.xlu0 %804 }
 0x247   :  { %814 = vrot.lane.b32.xlu1 %v2895_v0, %s2271_s0  ;;  %v696_v0 = vmax.f32 %v624_v53, %v630_v30  ;;  %v704_v53 = vmax.f32 %v648_v46, %v654_v55  ;;  %v988_v30 = vld [vmem:[%s4083_s3 + $0x20] sm:$0xff] }
 0x249   :  { %v754_v23 = vsel %vm715_vm1, %v2952_v47, %v696_v0  ;;  %v758_v58 = vsel %vm715_vm1, %v2987_v7, %v704_v53  ;;  %v968_v7 = vld [vmem:[#allocation2] sm:$0xff] }
 0x24d   :  { %v3094_v63 = vpop.permute.xlu0 %808 }
 0x24f   :  { %818 = vrot.lane.b32.xlu1 %v2906_v3, %s2271_s0  ;;  %v636_v3 = vadd.f32 %v2912_v14, %v2908_v4  ;;  %v2058_v4 = vld [vmem:[%s4083_s3 + $0xd0] sm:$0xff]  ;;  %v1004_v14 = vld [vmem:[%s4083_s3 + $0xa0] sm:$0xff] }
 0x250   :  { %1111 = vmatpush.msrb.mxu1 %v2058_v4  ;;  %1280 = vmatpush.msra.mxu0 %v1004_v14  ;;  %v663_v4 = vadd.f32 %v4116_v32, %v2975_v54  ;;  %v669_v14 = vadd.f32 %v2996_v16, %v2998_v24  ;;  %v2061_v16 = vld [vmem:[%s4083_s3 + $0xe8] sm:$0xff]  ;;  %v4122_v32 = vld [vmem:[#allocation3_spill] sm:$0xff] }
 0x251   :  { %v700_v31 = vmax.f32 %v636_v3, %v642_v60  ;;  %v2056_v3 = vld [vmem:[%s4083_s3 + $0xc0] sm:$0xff] }
 0x252   :  { %1281 = vmatpush.msra.mxu0 %v1002_v10  ;;  %v984_v60 = vld [vmem:[%s4083_s3] sm:$0xff]  ;;  %1112 = vmatpush.msrb.mxu1 %v2056_v3  ;;  %v969_v10 = vld [vmem:[#allocation2 + $0x8] sm:$0xff]  ;;  %v710_v54 = vmax.f32 %v663_v4, %v669_v14 }
 0x253   :  { %v756_v38 = vsel %vm715_vm1, %v2969_v35, %v700_v31  ;;  %v702_v35 = vmax.f32 %v639_v44, %v645_v26  ;;  %v2065_v31 = vld [vmem:[%s4083_s3 + $0x108] sm:$0xff]  ;;  %v2059_v44 = vld [vmem:[%s4083_s3 + $0xd8] sm:$0xff] }
 0x254   :  { %1282 = vmatpush.msra.mxu0 %v1000_v9  ;;  %1173 = vmatpush.msrb.mxu3 %v2065_v31  ;;  %v761_v26 = vsel %vm715_vm1, %v3018_v40, %v710_v54  ;;  %v2166_v9 = vld [vmem:[%s4083_s3 + $0x230] sm:$0xff]  ;;  %v4123_v54 = vld [vmem:[#allocation4_spill] sm:$0xff] }
 0x255   :  { %v3108_v45 = vpop.permute.xlu0 %812  ;;  %v757_v37 = vsel %vm715_vm1, %v2979_v27, %v702_v35  ;;  %v991_v27 = vld [vmem:[%s4083_s3 + $0x38] sm:$0xff]  ;;  %1499 = vmatpush.msra.mxu1 %v2166_v9  ;;  %v4119_v35 = vld [vmem:[#allocation11_spill] sm:$0xff] }
 0x256   :  { %1283 = vmatpush.msra.mxu0 %v998_v11  ;;  %1352 = vmatpush.msra.mxu2 %v991_v27  ;;  %v3278_v11 = vld [vmem:[%s4084_s2] ss:$0 sm:$0xff] }
 0x257   :  { %822 = vrot.lane.b32.xlu1 %v754_v23, %s2271_s0  ;;  %v987_v23 = vld [vmem:[%s4083_s3 + $0x18] sm:$0xff]  ;;  %1174 = vmatpush.msrb.mxu3 %v2063_v50 }
 0x258   :  { %1284 = vmatpush.msra.mxu0 %v996_v52  ;;  %1353 = vmatpush.msra.mxu2 %v989_v51  ;;  %v4118_v52 = vld [vmem:[#allocation6_spill] sm:$0xff] }
 0x259   :  { %1175 = vmatpush.msrb.mxu3 %v2061_v16  ;;  %1500 = vmatpush.msra.mxu1 %v2164_v33 }
 0x25a   :  { %1285 = vmatpush.msra.mxu0 %v994_v34  ;;  %1354 = vmatpush.msra.mxu2 %v987_v23 }
 0x25b   :  { %1176 = vmatpush.msrb.mxu3 %v2059_v44 }
 0x25c   :  { %1286 = vmatpush.msra.mxu0 %v992_v49 }
 0x25d   :  { %v3117_v28 = vpop.permute.xlu0 %816 }
 0x25e   :  { %1287 = vmatpush.msra.mxu0 %v990_v62 }
 0x25f   :  { %826 = vrot.lane.b32.xlu1 %v755_v42, %s2271_s0  ;;  %v985_v42 = vld [vmem:[%s4083_s3 + $0x8] sm:$0xff] }
 0x260   :  { %1288 = vmatpush.msra.mxu0 %v988_v30  ;;  %1355 = vmatpush.msra.mxu2 %v985_v42 }
 0x261   :  { %2128 = vmatmul.msk.f32.vlgmr.msra.gmra.mxu2 %vm945_vm2, %v968_v7 }
 0x262   :  { %1289 = vmatpush.msra.mxu0 %v986_v18 }
 0x264   :  { %1290 = vmatpush.msra.mxu0 %v984_v60 }
 0x265   :  { %v3144_v47 = vpop.permute.xlu0 %820  ;;  %2112 = vmatmul.msk.f32.vlgmr.msra.gmra.mxu0 %vm945_vm2, %v968_v7 }
 0x267   :  { %830 = vrot.lane.b32.xlu1 %v756_v38, %s2271_s0  ;;  %v2057_v38 = vld [vmem:[%s4083_s3 + $0xc8] sm:$0xff] }
 0x268   :  { %1177 = vmatpush.msrb.mxu3 %v2057_v38 }
 0x269   :  { %2129 = vmatmul.msk.f32.gmra.mxu2 %vm945_vm2, %v969_v10 }
 0x26d   :  { %v3177_v20 = vpop.permute.xlu0 %824  ;;  %2113 = vmatmul.msk.f32.gmra.mxu0 %vm945_vm2, %v969_v10 }
 0x26f   :  { %834 = vrot.lane.b32.xlu1 %v757_v37, %s2271_s0  ;;  %v4120_v37 = vld [vmem:[#allocation13_spill] sm:$0xff] }
 0x275   :  { %v3214_v0 = vpop.permute.xlu0 %828 }
 0x277   :  { %838 = vrot.lane.b32.xlu1 %v758_v58, %s2271_s0  ;;  %v4121_v58 = vld [vmem:[#allocation14_spill] sm:$0xff] }
 0x27d   :  { %v3239_v36 = vpop.permute.xlu0 %832 }
 0x27f   :  { %844 = vrot.lane.b32.xlu1 %v4117_v29, %s2271_s0 }
 0x285   :  { %v3261_v24 = vpop.permute.xlu0 %836 }
 0x287   :  { %850 = vrot.lane.b32.xlu1 %v761_v26, %s2271_s0 }
 0x28d   :  { %v843_v40 = vpop.permute.xlu0 %842 }
 0x28e   :  { %v872_v15 = vsel %vm860_vm3, %v841_v1, %v843_v40  ;;  %v4124_v40 = vld [vmem:[#allocation5_spill] sm:$0xff] }
 0x28f   :  { %v904_v41 = vmax.f32 %v4118_v52, %v872_v15  ;;  %856 = vrot.lane.b32.xlu1 %v4119_v35, %s2271_s0 }
 0x291   :  { %v924_v34 = vadd.f32 %v3278_v11, %v904_v41 }
 0x293   :  { %v940_v8 = vmax.f32 %v924_v34, 0.0 }
 0x295   :  { %963 = vst.msk [vmem:[#allocation2 + $0x68] sm:$0xff] %vm945_vm2, %v940_v8  ;;  %v3288_v46 = vpop.permute.xlu0 %848 }
 0x299   :  { %v799_v61 = vpop.permute.xlu1 %798 }
 0x29a   :  { %v861_v55 = vsel %vm860_vm3, %v3070_v19, %v799_v61  ;;  %v2162_v19 = vld [vmem:[%s4083_s3 + $0x210] sm:$0xff] }
 0x29b   :  { %v893_v49 = vmax.f32 %v4120_v37, %v861_v55  ;;  %1501 = vmatpush.msra.mxu1 %v2162_v19 }
 0x29d   :  { %v913_v62 = vadd.f32 %v3278_v11, %v893_v49  ;;  %v855_v27 = vpop.permute.xlu0 %854 }
 0x29e   :  { %v875_v12 = vsel %vm860_vm3, %v853_v21, %v855_v27 }
 0x29f   :  { %v929_v53 = vmax.f32 %v913_v62, 0.0  ;;  %v907_v30 = vmax.f32 %v2944_v22, %v875_v12 }
 0x2a1   :  { %952 = vst.msk [vmem:[#allocation2 + $0x10] sm:$0xff] %vm945_vm2, %v929_v53  ;;  %v927_v51 = vadd.f32 %v3278_v11, %v907_v30  ;;  %v803_v6 = vpop.permute.xlu1 %802 }
 0x2a2   :  { %v862_v18 = vsel %vm860_vm3, %v3080_v13, %v803_v6  ;;  %v2160_v13 = vld [vmem:[%s4083_s3 + $0x200] sm:$0xff] }
 0x2a3   :  { %v943_v23 = vmax.f32 %v927_v51, 0.0  ;;  %v894_v3 = vmax.f32 %v4121_v58, %v862_v18  ;;  %1502 = vmatpush.msra.mxu1 %v2160_v13 }
 0x2a5   :  { %966 = vst.msk [vmem:[#allocation2 + $0x80] sm:$0xff] %vm945_vm2, %v943_v23  ;;  %v914_v22 = vadd.f32 %v3278_v11, %v894_v3 }
 0x2a7   :  { %v930_v60 = vmax.f32 %v914_v22, 0.0 }
 0x2a8   :  { %v1008_v42 = vld [vmem:[#allocation2 + $0x10] sm:$0xff] }
 0x2a9   :  { %953 = vst.msk [vmem:[#allocation2 + $0x18] sm:$0xff] %vm945_vm2, %v930_v60  ;;  %v807_v7 = vpop.permute.xlu1 %806  ;;  %2080 = vmatmul.msk.f32.vlgmr.msrb.gmra.mxu1 %vm945_vm2, %v1008_v42  ;;  %2096 = vmatmul.msk.f32.vlgmr.msrb.gmra.mxu3 %vm945_vm2, %v1008_v42 }
 0x2aa   :  { %v863_v56 = vsel %vm860_vm3, %v3090_v39, %v807_v7  ;;  %2114 = vmatmul.msk.f32.gmra.mxu0 %vm945_vm2, %v1008_v42  ;;  %2130 = vmatmul.msk.f32.gmra.mxu2 %vm945_vm2, %v1008_v42 }
 0x2ab   :  { %v895_v4 = vmax.f32 %v4122_v32, %v863_v56 }
 0x2ad   :  { %v915_v14 = vadd.f32 %v3278_v11, %v895_v4 }
 0x2af   :  { %v931_v31 = vmax.f32 %v915_v14, 0.0 }
 0x2b0   :  { %v1009_v10 = vld [vmem:[#allocation2 + $0x18] sm:$0xff] }
 0x2b1   :  { %954 = vst.msk [vmem:[#allocation2 + $0x20] sm:$0xff] %vm945_vm2, %v931_v31  ;;  %v811_v50 = vpop.permute.xlu1 %810  ;;  %2081 = vmatmul.msk.f32.gmra.mxu1 %vm945_vm2, %v1009_v10  ;;  %2097 = vmatmul.msk.f32.gmra.mxu3 %vm945_vm2, %v1009_v10 }
 0x2b2   :  { %v864_v39 = vsel %vm860_vm3, %v3094_v63, %v811_v50  ;;  %2115 = vmatmul.msk.f32.gmra.mxu0 %vm945_vm2, %v1009_v10  ;;  %2131 = vmatmul.msk.f32.gmra.mxu2 %vm945_vm2, %v1009_v10  ;;  %v2158_v63 = vld [vmem:[%s4083_s3 + $0x1f0] sm:$0xff] }
 0x2b3   :  { %v896_v16 = vmax.f32 %v4123_v54, %v864_v39  ;;  %1503 = vmatpush.msra.mxu1 %v2158_v63  ;;  %v2146_v39 = vld [vmem:[%s4083_s3 + $0x190] sm:$0xff]  ;;  %v2165_v54 = vld [vmem:[%s4083_s3 + $0x228] sm:$0xff] }
 0x2b4   :  { %v2161_v63 = vld [vmem:[%s4083_s3 + $0x208] sm:$0xff] }
 0x2b5   :  { %v916_v44 = vadd.f32 %v3278_v11, %v896_v16  ;;  %v2163_v16 = vld [vmem:[%s4083_s3 + $0x218] sm:$0xff] }
 0x2b7   :  { %v932_v26 = vmax.f32 %v916_v44, 0.0 }
 0x2b8   :  { %v3330_v38 = vld [vmem:[#allocation2 + $0x20] sm:$0xff] }
 0x2b9   :  { %955 = vst.msk [vmem:[#allocation2 + $0x28] sm:$0xff] %vm945_vm2, %v932_v26  ;;  %v815_v9 = vpop.permute.xlu1 %814  ;;  %2082 = vmatmul.msk.f32.gmra.mxu1 %vm945_vm2, %v3330_v38  ;;  %2098 = vmatmul.msk.f32.gmra.mxu3 %vm945_vm2, %v3330_v38 }
 0x2ba   :  { %v865_v1 = vsel %vm860_vm3, %v3108_v45, %v815_v9  ;;  %2116 = vmatmul.msk.f32.gmra.mxu0 %vm945_vm2, %v3330_v38  ;;  %2132 = vmatmul.msk.f32.gmra.mxu2 %vm945_vm2, %v3330_v38  ;;  %v2156_v45 = vld [vmem:[%s4083_s3 + $0x1e0] sm:$0xff] }
 0x2bb   :  { %v897_v15 = vmax.f32 %v4124_v40, %v865_v1  ;;  %1504 = vmatpush.msra.mxu1 %v2156_v45  ;;  %v2159_v40 = vld [vmem:[%s4083_s3 + $0x1f8] sm:$0xff]  ;;  %v3507_v45 = vld [vmem:[#allocation2 + $0x68] sm:$0xff] }
 0x2bd   :  { %v917_v52 = vadd.f32 %v3278_v11, %v897_v15  ;;  %v2144_v15 = vld [vmem:[%s4083_s3 + $0x180] sm:$0xff] }
 0x2bf   :  { %v933_v41 = vmax.f32 %v917_v52, 0.0 }
 0x2c0   :  { %v3348_v34 = vld [vmem:[#allocation2 + $0x28] sm:$0xff] }
 0x2c1   :  { %956 = vst.msk [vmem:[#allocation2 + $0x30] sm:$0xff] %vm945_vm2, %v933_v41  ;;  %v819_v8 = vpop.permute.xlu1 %818  ;;  %2083 = vmatmul.msk.f32.gmra.mxu1 %vm945_vm2, %v3348_v34  ;;  %2099 = vmatmul.msk.f32.gmra.mxu3 %vm945_vm2, %v3348_v34 }
 0x2c2   :  { %v866_v61 = vsel %vm860_vm3, %v3117_v28, %v819_v8  ;;  %2117 = vmatmul.msk.f32.gmra.mxu0 %vm945_vm2, %v3348_v34  ;;  %2133 = vmatmul.msk.f32.gmra.mxu2 %vm945_vm2, %v3348_v34  ;;  %v2154_v28 = vld [vmem:[%s4083_s3 + $0x1d0] sm:$0xff] }
 0x2c3   :  { %v898_v33 = vmax.f32 %v2790_v17, %v866_v61  ;;  %1505 = vmatpush.msra.mxu1 %v2154_v28  ;;  %v2155_v61 = vld [vmem:[%s4083_s3 + $0x1d8] sm:$0xff] }
 0x2c4   :  { %v2151_v28 = vld [vmem:[%s4083_s3 + $0x1b8] sm:$0xff] }
 0x2c5   :  { %v918_v55 = vadd.f32 %v3278_v11, %v898_v33  ;;  %v859_v33 = vpop.permute.xlu2 %858 }
 0x2c7   :  { %v934_v37 = vmax.f32 %v918_v55, 0.0 }
 0x2c8   :  { %v3366_v49 = vld [vmem:[#allocation2 + $0x30] sm:$0xff] }
 0x2c9   :  { %957 = vst.msk [vmem:[#allocation2 + $0x38] sm:$0xff] %vm945_vm2, %v934_v37  ;;  %v823_v21 = vpop.permute.xlu1 %822  ;;  %2084 = vmatmul.msk.f32.gmra.mxu1 %vm945_vm2, %v3366_v49  ;;  %2100 = vmatmul.msk.f32.gmra.mxu3 %vm945_vm2, %v3366_v49  ;;  %v2153_v37 = vld [vmem:[%s4083_s3 + $0x1c8] sm:$0xff] }
 0x2ca   :  { %v867_v17 = vsel %vm860_vm3, %v3144_v47, %v823_v21  ;;  %2118 = vmatmul.msk.f32.gmra.mxu0 %vm945_vm2, %v3366_v49  ;;  %2134 = vmatmul.msk.f32.gmra.mxu2 %vm945_vm2, %v3366_v49 }
 0x2cb   :  { %v899_v62 = vmax.f32 %v2821_v48, %v867_v17 }
 0x2cd   :  { %v919_v27 = vadd.f32 %v3278_v11, %v899_v62 }
 0x2cf   :  { %v935_v12 = vmax.f32 %v919_v27, 0.0 }
 0x2d0   :  { %v3384_v53 = vld [vmem:[#allocation2 + $0x38] sm:$0xff] }
 0x2d1   :  { %958 = vst.msk [vmem:[#allocation2 + $0x40] sm:$0xff] %vm945_vm2, %v935_v12  ;;  %v827_v30 = vpop.permute.xlu1 %826  ;;  %2085 = vmatmul.msk.f32.gmra.mxu1 %vm945_vm2, %v3384_v53  ;;  %2101 = vmatmul.msk.f32.gmra.mxu3 %vm945_vm2, %v3384_v53  ;;  %v2149_v12 = vld [vmem:[%s4083_s3 + $0x1a8] sm:$0xff] }
 0x2d2   :  { %v868_v47 = vsel %vm860_vm3, %v3177_v20, %v827_v30  ;;  %2119 = vmatmul.msk.f32.gmra.mxu0 %vm945_vm2, %v3384_v53  ;;  %2135 = vmatmul.msk.f32.gmra.mxu2 %vm945_vm2, %v3384_v53  ;;  %v2152_v20 = vld [vmem:[%s4083_s3 + $0x1c0] sm:$0xff] }
 0x2d3   :  { %v900_v48 = vmax.f32 %v2835_v59, %v868_v47  ;;  %1506 = vmatpush.msra.mxu1 %v2152_v20  ;;  %v3560_v47 = vld [vmem:[#allocation2 + $0x80] sm:$0xff] }
 0x2d5   :  { %v920_v51 = vadd.f32 %v3278_v11, %v900_v48 }
 0x2d7   :  { %v936_v6 = vmax.f32 %v920_v51, 0.0 }
 0x2d8   :  { %v3399_v19 = vld [vmem:[#allocation2 + $0x40] sm:$0xff] }
 0x2d9   :  { %959 = vst.msk [vmem:[#allocation2 + $0x48] sm:$0xff] %vm945_vm2, %v936_v6  ;;  %v831_v18 = vpop.permute.xlu1 %830  ;;  %2086 = vmatmul.msk.f32.gmra.mxu1 %vm945_vm2, %v3399_v19  ;;  %2102 = vmatmul.msk.f32.gmra.mxu3 %vm945_vm2, %v3399_v19 }
 0x2da   :  { %v869_v59 = vsel %vm860_vm3, %v3214_v0, %v831_v18  ;;  %2120 = vmatmul.msk.f32.gmra.mxu0 %vm945_vm2, %v3399_v19  ;;  %2136 = vmatmul.msk.f32.gmra.mxu2 %vm945_vm2, %v3399_v19  ;;  %v2150_v0 = vld [vmem:[%s4083_s3 + $0x1b0] sm:$0xff] }
 0x2db   :  { %v901_v23 = vmax.f32 %v2860_v25, %v869_v59  ;;  %1507 = vmatpush.msra.mxu1 %v2150_v0 }
 0x2dd   :  { %v921_v58 = vadd.f32 %v3278_v11, %v901_v23 }
 0x2df   :  { %v937_v3 = vmax.f32 %v921_v58, 0.0 }
 0x2e0   :  { %v3417_v22 = vld [vmem:[#allocation2 + $0x48] sm:$0xff] }
 0x2e1   :  { %960 = vst.msk [vmem:[#allocation2 + $0x50] sm:$0xff] %vm945_vm2, %v937_v3  ;;  %v835_v60 = vpop.permute.xlu1 %834  ;;  %2087 = vmatmul.msk.f32.gmra.mxu1 %vm945_vm2, %v3417_v22  ;;  %2103 = vmatmul.msk.f32.gmra.mxu3 %vm945_vm2, %v3417_v22 }
 0x2e2   :  { %v870_v25 = vsel %vm860_vm3, %v3239_v36, %v835_v60  ;;  %2121 = vmatmul.msk.f32.gmra.mxu0 %vm945_vm2, %v3417_v22  ;;  %2137 = vmatmul.msk.f32.gmra.mxu2 %vm945_vm2, %v3417_v22 }
 0x2e3   :  { %v902_v42 = vmax.f32 %v2874_v43, %v870_v25  ;;  %v2148_v43 = vld [vmem:[%s4083_s3 + $0x1a0] sm:$0xff] }
 0x2e4   :  { %1508 = vmatpush.msra.mxu1 %v2148_v43  ;;  %v3566_v48 = vpop.f32.mrf.mxu2 }
 0x2e5   :  { %v922_v7 = vadd.f32 %v3278_v11, %v902_v42 }
 0x2e6   :  { %1509 = vmatpush.msra.mxu1 %v2146_v39 }
 0x2e7   :  { %v938_v13 = vmax.f32 %v922_v7, 0.0 }
 0x2e8   :  { %v3435_v56 = vld [vmem:[#allocation2 + $0x50] sm:$0xff]  ;;  %1510 = vmatpush.msra.mxu1 %v2144_v15 }
 0x2e9   :  { %961 = vst.msk [vmem:[#allocation2 + $0x58] sm:$0xff] %vm945_vm2, %v938_v13  ;;  %v839_v32 = vpop.permute.xlu1 %838  ;;  %2088 = vmatmul.msk.f32.gmra.mxu1 %vm945_vm2, %v3435_v56  ;;  %2104 = vmatmul.msk.f32.gmra.mxu3 %vm945_vm2, %v3435_v56  ;;  %v1420_v15 = vld [vmem:[#allocation2 + $0x90] sm:$0xff] }
 0x2ea   :  { %v871_v36 = vsel %vm860_vm3, %v3261_v24, %v839_v32  ;;  %2122 = vmatmul.msk.f32.gmra.mxu0 %vm945_vm2, %v3435_v56  ;;  %2138 = vmatmul.msk.f32.gmra.mxu2 %vm945_vm2, %v3435_v56 }
 0x2eb   :  { %v903_v4 = vmax.f32 %v2899_v2, %v871_v36  ;;  %v2167_v2 = vld [vmem:[%s4083_s3 + $0x238] sm:$0xff] }
 0x2ec   :  { %1564 = vmatpush.msra.mxu3 %v2167_v2  ;;  %v3574_v6 = vpop.f32.mrf.mxu2 }
 0x2ed   :  { %v923_v14 = vadd.f32 %v3278_v11, %v903_v4 }
 0x2ee   :  { %1565 = vmatpush.msra.mxu3 %v2165_v54 }
 0x2ef   :  { %v939_v31 = vmax.f32 %v923_v14, 0.0 }
 0x2f0   :  { %v3453_v10 = vld [vmem:[#allocation2 + $0x58] sm:$0xff]  ;;  %1566 = vmatpush.msra.mxu3 %v2163_v16 }
 0x2f1   :  { %962 = vst.msk [vmem:[#allocation2 + $0x60] sm:$0xff] %vm945_vm2, %v939_v31  ;;  %v845_v24 = vpop.permute.xlu1 %844  ;;  %2089 = vmatmul.msk.f32.gmra.mxu1 %vm945_vm2, %v3453_v10  ;;  %2105 = vmatmul.msk.f32.gmra.mxu3 %vm945_vm2, %v3453_v10 }
 0x2f2   :  { %v873_v50 = vsel %vm860_vm3, %v845_v24, %v3285_v5  ;;  %2123 = vmatmul.msk.f32.gmra.mxu0 %vm945_vm2, %v3453_v10  ;;  %2139 = vmatmul.msk.f32.gmra.mxu2 %vm945_vm2, %v3453_v10 }
 0x2f3   :  { %v905_v5 = vmax.f32 %v4117_v29, %v873_v50  ;;  %1567 = vmatpush.msra.mxu3 %v2161_v63 }
 0x2f5   :  { %v925_v44 = vadd.f32 %v3278_v11, %v905_v5  ;;  %1568 = vmatpush.msra.mxu3 %v2159_v40 }
 0x2f7   :  { %v941_v26 = vmax.f32 %v925_v44, 0.0  ;;  %v1292_v44 = vpop.f32.mrf.mxu0 }
 0x2f8   :  { %v3480_v9 = vld [vmem:[#allocation2 + $0x60] sm:$0xff] }
 0x2f9   :  { %964 = vst.msk [vmem:[#allocation2 + $0x70] sm:$0xff] %vm945_vm2, %v941_v26  ;;  %v851_v29 = vpop.permute.xlu1 %850  ;;  %2090 = vmatmul.msk.f32.gmra.mxu1 %vm945_vm2, %v3480_v9  ;;  %2106 = vmatmul.msk.f32.gmra.mxu3 %vm945_vm2, %v3480_v9 }
 0x2fa   :  { %v874_v1 = vsel %vm860_vm3, %v3288_v46, %v851_v29  ;;  %2124 = vmatmul.msk.f32.gmra.mxu0 %vm945_vm2, %v3480_v9  ;;  %2140 = vmatmul.msk.f32.gmra.mxu2 %vm945_vm2, %v3480_v9  ;;  %v2157_v46 = vld [vmem:[%s4083_s3 + $0x1e8] sm:$0xff] }
 0x2fb   :  { %v906_v52 = vmax.f32 %v2932_v57, %v874_v1  ;;  %1569 = vmatpush.msra.mxu3 %v2157_v46 }
 0x2fd   :  { %v926_v41 = vadd.f32 %v3278_v11, %v906_v52  ;;  %1570 = vmatpush.msra.mxu3 %v2155_v61 }
 0x2ff   :  { %v942_v8 = vmax.f32 %v926_v41, 0.0  ;;  %1571 = vmatpush.msra.mxu3 %v2153_v37  ;;  %v1295_v29 = vpop.f32.mrf.mxu0 }
 0x300   :  { %v3530_v27 = vld [vmem:[#allocation2 + $0x70] sm:$0xff] }
 0x301   :  { %965 = vst.msk [vmem:[#allocation2 + $0x78] sm:$0xff] %vm945_vm2, %v942_v8  ;;  %v857_v57 = vpop.permute.xlu1 %856  ;;  %2091 = vmatmul.msk.f32.gmra.mxu1 %vm945_vm2, %v3507_v45  ;;  %2107 = vmatmul.msk.f32.gmra.mxu3 %vm945_vm2, %v3507_v45  ;;  %v1421_v8 = vld [vmem:[#allocation2 + $0x98] sm:$0xff] }
 0x302   :  { %v876_v55 = vsel %vm860_vm3, %v857_v57, %v859_v33  ;;  %2125 = vmatmul.msk.f32.gmra.mxu0 %vm945_vm2, %v3507_v45  ;;  %2141 = vmatmul.msk.f32.gmra.mxu2 %vm945_vm2, %v3507_v45 }
 0x303   :  { %v908_v21 = vmax.f32 %v4119_v35, %v876_v55  ;;  %1572 = vmatpush.msra.mxu3 %v2151_v28  ;;  %v2145_v35 = vld [vmem:[%s4083_s3 + $0x188] sm:$0xff] }
 0x305   :  { %v928_v17 = vadd.f32 %v3278_v11, %v908_v21  ;;  %v2147_v11 = vld [vmem:[%s4083_s3 + $0x198] sm:$0xff]  ;;  %1573 = vmatpush.msra.mxu3 %v2149_v12 }
 0x307   :  { %v944_v62 = vmax.f32 %v928_v17, 0.0  ;;  %1574 = vmatpush.msra.mxu3 %v2147_v11 }
 0x308   :  { %v3550_v30 = vld [vmem:[#allocation2 + $0x78] sm:$0xff] }
 0x309   :  { %967 = vst.msk [vmem:[#allocation2 + $0x88] sm:$0xff] %vm945_vm2, %v944_v62  ;;  %2092 = vmatmul.msk.f32.gmra.mxu1 %vm945_vm2, %v3530_v27  ;;  %2108 = vmatmul.msk.f32.gmra.mxu3 %vm945_vm2, %v3530_v27 }
 0x30a   :  { %2126 = vmatmul.msk.f32.gmra.mxu0 %vm945_vm2, %v3530_v27  ;;  %2142 = vmatmul.msk.f32.gmra.mxu2 %vm945_vm2, %v3530_v27 }
 0x30b   :  { %1575 = vmatpush.msra.mxu3 %v2145_v35 }
 0x310   :  { %v3568_v51 = vld [vmem:[#allocation2 + $0x88] sm:$0xff] }
 0x311   :  { %2093 = vmatmul.msk.f32.gmra.mxu1 %vm945_vm2, %v3550_v30  ;;  %2109 = vmatmul.msk.f32.gmra.mxu3 %vm945_vm2, %v3550_v30 }
 0x312   :  { %2127 = vmatmul.msk.f32.gmra.mxu0 %vm945_vm2, %v3550_v30  ;;  %2143 = vmatmul.msk.f32.gmra.mxu2 %vm945_vm2, %v3550_v30 }
 0x319   :  { %2094 = vmatmul.msk.f32.gmra.mxu1 %vm945_vm2, %v3560_v47  ;;  %2110 = vmatmul.msk.f32.gmra.mxu3 %vm945_vm2, %v3560_v47 }
 0x321   :  { %2095 = vmatmul.msk.f32.gmra.mxu1 %vm945_vm2, %v3568_v51  ;;  %2111 = vmatmul.msk.f32.gmra.mxu3 %vm945_vm2, %v3568_v51 }
 0x326   :  { %v3576_v18 = vpop.f32.mrf.mxu1 }
 0x327   :  { %v1298_v52 = vpop.f32.mrf.mxu0  ;;  %v1293_v28 = vadd.f32 %v1292_v44, %v3576_v18 }
 0x329   :  { %2168 = vmatmul.msk.f32.vlgmr.msra.gmra.mxu1 %vm945_vm2, %v3330_v38  ;;  %2184 = vmatmul.msk.f32.vlgmr.msra.gmra.mxu3 %vm945_vm2, %v3330_v38 }
 0x32c   :  { %v3582_v20 = vpop.f32.mrf.mxu3 }
 0x32d   :  { %v3584_v59 = vpop.f32.mrf.mxu2 }
 0x32e   :  { %v3586_v23 = vpop.f32.mrf.mxu1 }
 0x32f   :  { %v1296_v18 = vadd.f32 %v1295_v29, %v3586_v23 }
 0x331   :  { %2169 = vmatmul.msk.f32.gmra.mxu1 %vm945_vm2, %v3348_v34  ;;  %2185 = vmatmul.msk.f32.gmra.mxu3 %vm945_vm2, %v3348_v34 }
 0x334   :  { %v3592_v58 = vpop.f32.mrf.mxu3 }
 0x335   :  { %v3596_v60 = vpop.f32.mrf.mxu2 }
 0x336   :  { %v3594_v3 = vpop.f32.mrf.mxu1 }
 0x337   :  { %v1299_v17 = vadd.f32 %v1298_v52, %v3594_v3 }
 0x339   :  { %2170 = vmatmul.msk.f32.gmra.mxu1 %vm945_vm2, %v3366_v49  ;;  %2186 = vmatmul.msk.f32.gmra.mxu3 %vm945_vm2, %v3366_v49 }
 0x33c   :  { %v3602_v38 = vpop.f32.mrf.mxu3 }
 0x33d   :  { %v3610_v34 = vpop.f32.mrf.mxu2 }
 0x33e   :  { %v3604_v0 = vpop.f32.mrf.mxu1 }
 0x341   :  { %2171 = vmatmul.msk.f32.gmra.mxu1 %vm945_vm2, %v3384_v53  ;;  %2187 = vmatmul.msk.f32.gmra.mxu3 %vm945_vm2, %v3384_v53 }
 0x344   :  { %v3612_v25 = vpop.f32.mrf.mxu3 }
 0x345   :  { %v3620_v49 = vpop.f32.mrf.mxu2  ;;  %v1367_v23 = vadd.f32 %v3596_v60, %v3612_v25 }
 0x346   :  { %v3614_v42 = vpop.f32.mrf.mxu1 }
 0x349   :  { %2172 = vmatmul.msk.f32.gmra.mxu1 %vm945_vm2, %v3399_v19  ;;  %2188 = vmatmul.msk.f32.gmra.mxu3 %vm945_vm2, %v3399_v19 }
 0x34c   :  { %v3622_v7 = vpop.f32.mrf.mxu3 }
 0x34d   :  { %v3632_v32 = vpop.f32.mrf.mxu2 }
 0x34e   :  { %v3624_v13 = vpop.f32.mrf.mxu1 }
 0x351   :  { %2173 = vmatmul.msk.f32.gmra.mxu1 %vm945_vm2, %v3417_v22  ;;  %2189 = vmatmul.msk.f32.gmra.mxu3 %vm945_vm2, %v3417_v22 }
 0x354   :  { %v3630_v53 = vpop.f32.mrf.mxu3 }
 0x355   :  { %v3644_v4 = vpop.f32.mrf.mxu2 }
 0x356   :  { %v3634_v36 = vpop.f32.mrf.mxu1 }
 0x359   :  { %2174 = vmatmul.msk.f32.gmra.mxu1 %vm945_vm2, %v3435_v56  ;;  %2190 = vmatmul.msk.f32.gmra.mxu3 %vm945_vm2, %v3435_v56 }
 0x35c   :  { %v3640_v19 = vpop.f32.mrf.mxu3 }
 0x35d   :  { %v3658_v56 = vpop.f32.mrf.mxu2 }
 0x35e   :  { %v3642_v43 = vpop.f32.mrf.mxu1 }
 0x361   :  { %2175 = vmatmul.msk.f32.gmra.mxu1 %vm945_vm2, %v3453_v10  ;;  %2191 = vmatmul.msk.f32.gmra.mxu3 %vm945_vm2, %v3453_v10 }
 0x364   :  { %v3650_v22 = vpop.f32.mrf.mxu3 }
 0x365   :  { %v1384_v10 = vpop.f32.mrf.mxu2 }
 0x366   :  { %v3652_v14 = vpop.f32.mrf.mxu1 }
 0x369   :  { %2176 = vmatmul.msk.f32.gmra.mxu1 %vm945_vm2, %v3480_v9  ;;  %2192 = vmatmul.msk.f32.gmra.mxu3 %vm945_vm2, %v3480_v9 }
 0x36c   :  { %v3660_v31 = vpop.f32.mrf.mxu3 }
 0x36e   :  { %v3662_v24 = vpop.f32.mrf.mxu1 }
 0x371   :  { %2177 = vmatmul.msk.f32.gmra.mxu1 %vm945_vm2, %v3507_v45  ;;  %2193 = vmatmul.msk.f32.gmra.mxu3 %vm945_vm2, %v3507_v45  ;;  %v1301_v45 = vpop.f32.mrf.mxu0 }
 0x372   :  { %v1302_v3 = vadd.f32 %v1301_v45, %v3604_v0 }
 0x374   :  { %v1206_v50 = vpop.f32.mrf.mxu3 }
 0x375   :  { %v3668_v2 = vadd.f32 %v1384_v10, %v1206_v50 }
 0x376   :  { %v3670_v39 = vpop.f32.mrf.mxu1 }
 0x379   :  { %2178 = vmatmul.msk.f32.gmra.mxu1 %vm945_vm2, %v3530_v27  ;;  %2194 = vmatmul.msk.f32.gmra.mxu3 %vm945_vm2, %v3530_v27  ;;  %v1304_v55 = vpop.f32.mrf.mxu0 }
 0x37c   :  { %v3676_v54 = vpop.f32.mrf.mxu3 }
 0x37e   :  { %v3678_v5 = vpop.f32.mrf.mxu1 }
 0x381   :  { %2179 = vmatmul.msk.f32.gmra.mxu1 %vm945_vm2, %v3550_v30  ;;  %2195 = vmatmul.msk.f32.gmra.mxu3 %vm945_vm2, %v3550_v30  ;;  %v1307_v11 = vpop.f32.mrf.mxu0  ;;  %v1358_v30 = vadd.f32 %v3566_v48, %v3582_v20 }
 0x384   :  { %v3684_v16 = vpop.f32.mrf.mxu3 }
 0x386   :  { %v3686_v26 = vpop.f32.mrf.mxu1 }
 0x389   :  { %2180 = vmatmul.msk.f32.gmra.mxu1 %vm945_vm2, %v3560_v47  ;;  %2196 = vmatmul.msk.f32.gmra.mxu3 %vm945_vm2, %v3560_v47  ;;  %v1364_v47 = vadd.f32 %v3584_v59, %v3602_v38  ;;  %v1310_v59 = vpop.f32.mrf.mxu0  ;;  %v1361_v38 = vadd.f32 %v3574_v6, %v3592_v58  ;;  %v1305_v6 = vadd.f32 %v1304_v55, %v3614_v42 }
 0x38a   :  { %v1311_v58 = vadd.f32 %v1310_v59, %v3634_v36  ;;  %v1308_v42 = vadd.f32 %v1307_v11, %v3624_v13  ;;  %v1379_v13 = vadd.f32 %v3644_v4, %v3650_v22 }
 0x38c   :  { %v3692_v9 = vpop.f32.mrf.mxu3 }
 0x38e   :  { %v3694_v63 = vpop.f32.mrf.mxu1 }
 0x391   :  { %2181 = vmatmul.msk.f32.gmra.mxu1 %vm945_vm2, %v3568_v51  ;;  %2197 = vmatmul.msk.f32.gmra.mxu3 %vm945_vm2, %v3568_v51 }
 0x394   :  { %v3700_v1 = vpop.f32.mrf.mxu3 }
 0x396   :  { %v3702_v40 = vpop.f32.mrf.mxu1 }
 0x399   :  { %2182 = vmatmul.msk.f32.gmra.mxu1 %vm945_vm2, %v1420_v15  ;;  %2198 = vmatmul.msk.f32.gmra.mxu3 %vm945_vm2, %v1420_v15 }
 0x39c   :  { %v3706_v46 = vpop.f32.mrf.mxu3 }
 0x39e   :  { %v3708_v41 = vpop.f32.mrf.mxu1 }
 0x3a1   :  { %2183 = vmatmul.msk.f32.gmra.mxu1 %vm945_vm2, %v1421_v8  ;;  %2199 = vmatmul.msk.f32.gmra.mxu3 %vm945_vm2, %v1421_v8 }
 0x3a4   :  { %v3712_v61 = vpop.f32.mrf.mxu3 }
 0x3a6   :  { %v1512_v33 = vpop.f32.mrf.mxu1 }
 0x3a7   :  { %v1625_v27 = vadd.f32 %v1512_v33, %v1293_v28 }
 0x3ac   :  { %v1577_v57 = vpop.f32.mrf.mxu3 }
 0x3ad   :  { %v3726_v10 = vadd.f32 %v1577_v57, %v1358_v30  ;;  %v1313_v57 = vpop.f32.mrf.mxu0  ;;  %v1376_v30 = vadd.f32 %v3632_v32, %v3640_v19  ;;  %v1373_v19 = vadd.f32 %v3620_v49, %v3630_v53 }
 0x3ae   :  { %v1515_v37 = vpop.f32.mrf.mxu1  ;;  %v1314_v36 = vadd.f32 %v1313_v57, %v3642_v43 }
 0x3af   :  { %v1627_v15 = vadd.f32 %v1515_v37, %v1296_v18 }
 0x3b4   :  { %v1580_v21 = vpop.f32.mrf.mxu3 }
 0x3b5   :  { %v3740_v29 = vadd.f32 %v1580_v21, %v1361_v38  ;;  %v1316_v60 = vpop.f32.mrf.mxu0 }
 0x3b6   :  { %v1518_v62 = vpop.f32.mrf.mxu1  ;;  %v1317_v4 = vadd.f32 %v1316_v60, %v3652_v14 }
 0x3b7   :  { %v1629_v12 = vadd.f32 %v1518_v62, %v1299_v17 }
 0x3b9   :  { %v3716_v35 = vmax.f32 %v1625_v27, %v1629_v12  ;;  %v1370_v12 = vadd.f32 %v3610_v34, %v3622_v7 }
 0x3bb   :  { %1673 = vrot.lane.b32.xlu0 %v3716_v35, %s2270_s18 }
 0x3bc   :  { %v1583_v51 = vpop.f32.mrf.mxu3 }
 0x3bd   :  { %v3728_v50 = vadd.f32 %v1583_v51, %v1364_v47 }
 0x3be   :  { %v1521_v44 = vpop.f32.mrf.mxu1 }
 0x3bf   :  { %v1658_v48 = vmax.f32 %v3726_v10, %v3728_v50  ;;  %v1631_v20 = vadd.f32 %v1521_v44, %v1302_v3  ;;  %v1319_v44 = vpop.f32.mrf.mxu0  ;;  %v1799_v10 = vld [vmem:[%s4086_s5 + $0x50] sm:$0xff] }
 0x3c0   :  { %v2210_v50 = vld [vmem:[%s4086_s5 + $0xb0] sm:$0xff] }
 0x3c1   :  { %v3732_v52 = vmax.f32 %v1627_v15, %v1631_v20 }
 0x3c3   :  { %1675 = vrot.lane.b32.xlu2 %v3732_v52, %s2270_s18 }
 0x3c4   :  { %v1586_v0 = vpop.f32.mrf.mxu3 }
 0x3c5   :  { %v3742_v8 = vadd.f32 %v1586_v0, %v1367_v23 }
 0x3c6   :  { %v1524_v45 = vpop.f32.mrf.mxu1 }
 0x3c7   :  { %v1660_v33 = vmax.f32 %v3740_v29, %v3742_v8  ;;  %v1633_v62 = vadd.f32 %v1524_v45, %v1305_v6  ;;  %v1322_v38 = vpop.f32.mrf.mxu0  ;;  %v1387_v45 = vpop.f32.mrf.mxu2  ;;  %v2211_v29 = vld [vmem:[%s4086_s5 + $0xb8] sm:$0xff] }
 0x3c8   :  { %v1323_v22 = vadd.f32 %v1322_v38, %v3670_v39  ;;  %v1320_v39 = vadd.f32 %v1319_v44, %v3662_v24  ;;  %1824 = vmatpush.msrb.mxu0 %v2211_v29 }
 0x3ca   :  { %1825 = vmatpush.msrb.mxu0 %v2210_v50 }
 0x3cc   :  { %v1589_v37 = vpop.f32.mrf.mxu3 }
 0x3cd   :  { %v3758_v55 = vadd.f32 %v1589_v37, %v1370_v12 }
 0x3ce   :  { %v1527_v28 = vpop.f32.mrf.mxu1 }
 0x3cf   :  { %v1635_v3 = vadd.f32 %v1527_v28, %v1308_v42  ;;  %v1325_v49 = vpop.f32.mrf.mxu0 }
 0x3d4   :  { %v1592_v17 = vpop.f32.mrf.mxu3 }
 0x3d5   :  { %v3772_v11 = vadd.f32 %v1592_v17, %v1373_v19 }
 0x3d6   :  { %v1530_v25 = vpop.f32.mrf.mxu1 }
 0x3d7   :  { %v1637_v27 = vadd.f32 %v1530_v25, %v1311_v58  ;;  %v1390_v58 = vpop.f32.mrf.mxu2  ;;  %v1382_v25 = vadd.f32 %v3658_v56, %v3660_v31  ;;  %v1328_v12 = vpop.f32.mrf.mxu0 }
 0x3d8   :  { %v1391_v42 = vadd.f32 %v1390_v58, %v3684_v16 }
 0x3d9   :  { %v3748_v21 = vmax.f32 %v1633_v62, %v1637_v27  ;;  %v1388_v62 = vadd.f32 %v1387_v45, %v3676_v54 }
 0x3db   :  { %1677 = vrot.lane.b32.xlu1 %v3748_v21, %s2270_s18 }
 0x3dc   :  { %v1595_v47 = vpop.f32.mrf.mxu3 }
 0x3dd   :  { %v3760_v51 = vadd.f32 %v1595_v47, %v1376_v30 }
 0x3de   :  { %v1533_v18 = vpop.f32.mrf.mxu1 }
 0x3df   :  { %v1662_v34 = vmax.f32 %v3758_v55, %v3760_v51  ;;  %v1639_v7 = vadd.f32 %v1533_v18, %v1314_v36  ;;  %v1393_v24 = vpop.f32.mrf.mxu2  ;;  %v1798_v55 = vld [vmem:[%s4086_s5 + $0x48] sm:$0xff] }
 0x3e0   :  { %v2209_v51 = vld [vmem:[%s4086_s5 + $0xa8] sm:$0xff] }
 0x3e1   :  { %v3764_v32 = vmax.f32 %v1635_v3, %v1639_v7  ;;  %v1331_v7 = vpop.f32.mrf.mxu0  ;;  %1826 = vmatpush.msrb.mxu0 %v2209_v51  ;;  %v2239_v51 = vld [vmem:[%s4086_s5 + $0x168] sm:$0xff] }
 0x3e3   :  { %1679 = vrot.lane.b32.xlu0 %v3764_v32, %s2270_s18 }
 0x3e4   :  { %v1598_v43 = vpop.f32.mrf.mxu3 }
 0x3e5   :  { %v3774_v15 = vadd.f32 %v1598_v43, %v1379_v13 }
 0x3e6   :  { %v1536_v20 = vpop.f32.mrf.mxu1 }
 0x3e7   :  { %v1664_v59 = vmax.f32 %v3772_v11, %v3774_v15  ;;  %v1641_v28 = vadd.f32 %v1536_v20, %v1317_v4  ;;  %v1396_v19 = vpop.f32.mrf.mxu2  ;;  %v1329_v20 = vadd.f32 %v1328_v12, %v3686_v26  ;;  %v1394_v4 = vadd.f32 %v1393_v24, %v3692_v9  ;;  %v1800_v24 = vld [vmem:[%s4086_s5 + $0x58] sm:$0xff]  ;;  %v2208_v11 = vld [vmem:[%s4086_s5 + $0xa0] sm:$0xff] }
 0x3e8   :  { %1853 = vmatpush.msrb.mxu2 %v1800_v24  ;;  %1827 = vmatpush.msrb.mxu0 %v2208_v11  ;;  %v1796_v15 = vld [vmem:[%s4086_s5 + $0x38] sm:$0xff] }
 0x3e9   :  { %v1334_v43 = vpop.f32.mrf.mxu0  ;;  %v2237_v11 = vld [vmem:[%s4086_s5 + $0x158] sm:$0xff] }
 0x3ea   :  { %v1335_v38 = vadd.f32 %v1334_v43, %v3702_v40  ;;  %1854 = vmatpush.msrb.mxu2 %v1799_v10  ;;  %v2204_v43 = vld [vmem:[%s4086_s5 + $0x80] sm:$0xff]  ;;  %v2221_v10 = vld [vmem:[%s4086_s5 + $0xe8] sm:$0xff] }
 0x3ec   :  { %v1601_v23 = vpop.f32.mrf.mxu3  ;;  %1855 = vmatpush.msrb.mxu2 %v1798_v55  ;;  %v2240_v55 = vld [vmem:[%s4086_s5 + $0x170] sm:$0xff] }
 0x3ed   :  { %v3792_v60 = vadd.f32 %v1601_v23, %v1382_v25 }
 0x3ee   :  { %v1539_v0 = vpop.f32.mrf.mxu1 }
 0x3ef   :  { %v1643_v47 = vadd.f32 %v1539_v0, %v1320_v39 }
 0x3f4   :  { %v1604_v53 = vpop.f32.mrf.mxu3 }
 0x3f5   :  { %v3781_v57 = vadd.f32 %v1604_v53, %v3668_v2  ;;  %v1326_v2 = vadd.f32 %v1325_v49, %v3678_v5  ;;  %v1399_v49 = vpop.f32.mrf.mxu2 }
 0x3f6   :  { %v1542_v37 = vpop.f32.mrf.mxu1 }
 0x3f7   :  { %v1645_v17 = vadd.f32 %v1542_v37, %v1323_v22  ;;  %v1400_v22 = vadd.f32 %v1399_v49, %v3706_v46  ;;  %v1337_v37 = vpop.f32.mrf.mxu0 }
 0x3f8   :  { %v1338_v26 = vadd.f32 %v1337_v37, %v3708_v41 }
 0x3f9   :  { %v3783_v6 = vmax.f32 %v1641_v28, %v1645_v17  ;;  %v1332_v17 = vadd.f32 %v1331_v7, %v3694_v63 }
 0x3fb   :  { %1681 = vrot.lane.b32.xlu2 %v3783_v6, %s2270_s18 }
 0x3fc   :  { %v1607_v14 = vpop.f32.mrf.mxu3 }
 0x3fd   :  { %v3794_v27 = vadd.f32 %v1607_v14, %v1388_v62  ;;  %v1402_v39 = vpop.f32.mrf.mxu2 }
 0x3fe   :  { %v1545_v30 = vpop.f32.mrf.mxu1  ;;  %v1403_v12 = vadd.f32 %v1402_v39, %v3712_v61 }
 0x3ff   :  { %v1666_v56 = vmax.f32 %v3792_v60, %v3794_v27  ;;  %v1647_v31 = vadd.f32 %v1545_v30, %v1326_v2  ;;  %v1397_v2 = vadd.f32 %v1396_v19, %v3700_v1  ;;  %v2207_v60 = vld [vmem:[%s4086_s5 + $0x98] sm:$0xff]  ;;  %v1794_v27 = vld [vmem:[%s4086_s5 + $0x28] sm:$0xff] }
 0x400   :  { %1828 = vmatpush.msrb.mxu0 %v2207_v60  ;;  %v2205_v19 = vld [vmem:[%s4086_s5 + $0x88] sm:$0xff]  ;;  %v2234_v60 = vld [vmem:[%s4086_s5 + $0x140] sm:$0xff] }
 0x401   :  { %v3798_v54 = vmax.f32 %v1643_v47, %v1647_v31 }
 0x403   :  { %1713 = vrot.lane.b32.xlu2 %v3716_v35, %s2271_s0 }
 0x404   :  { %v1610_v5 = vpop.f32.mrf.mxu3 }
 0x405   :  { %v3803_v36 = vadd.f32 %v1610_v5, %v1391_v42 }
 0x406   :  { %v1548_v18 = vpop.f32.mrf.mxu1 }
 0x407   :  { %v1668_v3 = vmax.f32 %v3781_v57, %v3803_v36  ;;  %v1649_v0 = vadd.f32 %v1548_v18, %v1329_v20  ;;  %v2203_v20 = vld [vmem:[%s4086_s5 + $0x78] sm:$0xff] }
 0x40b   :  { %1725 = vrot.lane.b32.xlu2 %v3764_v32, %s2271_s0 }
 0x40c   :  { %v1613_v44 = vpop.f32.mrf.mxu3 }
 0x40d   :  { %v3819_v40 = vadd.f32 %v1613_v44, %v1394_v4  ;;  %v1793_v44 = vld [vmem:[%s4086_s5 + $0x20] sm:$0xff]  ;;  %v2201_v4 = vld [vmem:[%s4086_s5 + $0x68] sm:$0xff] }
 0x40e   :  { %v1551_v13 = vpop.f32.mrf.mxu1 }
 0x40f   :  { %v1651_v62 = vadd.f32 %v1551_v13, %v1332_v17  ;;  %v1792_v13 = vld [vmem:[%s4086_s5 + $0x18] sm:$0xff] }
 0x410   :  { %v2227_v17 = vld [vmem:[%s4086_s5 + $0x118] sm:$0xff] }
 0x414   :  { %v1616_v16 = vpop.f32.mrf.mxu3 }
 0x415   :  { %v3833_v41 = vadd.f32 %v1616_v16, %v1397_v2  ;;  %v1791_v16 = vld [vmem:[%s4086_s5 + $0x10] sm:$0xff] }
 0x416   :  { %v1554_v23 = vpop.f32.mrf.mxu1 }
 0x417   :  { %v1653_v45 = vadd.f32 %v1554_v23, %v1335_v38  ;;  %v1790_v38 = vld [vmem:[%s4086_s5 + $0x8] sm:$0xff]  ;;  %v2202_v23 = vld [vmem:[%s4086_s5 + $0x70] sm:$0xff] }
 0x419   :  { %v3811_v53 = vmax.f32 %v1649_v0, %v1653_v45  ;;  %v1789_v0 = vld [vmem:[%s4086_s5] sm:$0xff] }
 0x41b   :  { %1685 = vrot.lane.b32.xlu1 %v3811_v53, %s2270_s18 }
 0x41c   :  { %v1619_v28 = vpop.f32.mrf.mxu3 }
 0x41d   :  { %v3821_v58 = vadd.f32 %v1619_v28, %v1400_v22  ;;  %v1676_v1 = vpop.permute.xlu2 %1675  ;;  %v2200_v22 = vld [vmem:[%s4086_s5 + $0x60] sm:$0xff] }
 0x41e   :  { %v1557_v25 = vpop.f32.mrf.mxu1  ;;  %v1690_v31 = vsel %vm715_vm1, %v1676_v1, %v1660_v33 }
 0x41f   :  { %v1670_v9 = vmax.f32 %v3819_v40, %v3821_v58  ;;  %v1655_v14 = vadd.f32 %v1557_v25, %v1338_v26  ;;  %v2226_v26 = vld [vmem:[%s4086_s5 + $0x110] sm:$0xff]  ;;  %v2225_v25 = vld [vmem:[%s4086_s5 + $0x108] sm:$0xff] }
 0x421   :  { %v3825_v46 = vmax.f32 %v1651_v62, %v1655_v14  ;;  %v2224_v62 = vld [vmem:[%s4086_s5 + $0x100] sm:$0xff] }
 0x423   :  { %1683 = vrot.lane.b32.xlu1 %v3798_v54, %s2270_s18  ;;  %1687 = vrot.lane.b32.xlu0 %v3825_v46, %s2270_s18 }
 0x424   :  { %v1622_v63 = vpop.f32.mrf.mxu3 }
 0x425   :  { %v3835_v30 = vadd.f32 %v1622_v63, %v1403_v12  ;;  %v3978_v12 = vld [vmem:[%s4085_s4] ss:$0 sm:$0xff] }
 0x427   :  { %v1672_v47 = vmax.f32 %v3833_v41, %v3835_v30 }
 0x42b   :  { %1721 = vrot.lane.b32.xlu1 %v3748_v21, %s2271_s0  ;;  %1717 = vrot.lane.b32.xlu0 %v3732_v52, %s2271_s0 }
 0x42d   :  { %v1674_v61 = vpop.permute.xlu0 %1673 }
 0x42e   :  { %v1689_v42 = vsel %vm715_vm1, %v1674_v61, %v1658_v48  ;;  %v2223_v61 = vld [vmem:[%s4086_s5 + $0xf8] sm:$0xff] }
 0x433   :  { %1719 = vrot.lane.b32.xlu1 %v1690_v31, %s2271_s0  ;;  %1715 = vrot.lane.b32.xlu0 %v1689_v42, %s2271_s0 }
 0x43b   :  { %1737 = vrot.lane.b32.xlu1 %v3811_v53, %s2271_s0 }
 0x44d   :  { %v1678_v48 = vpop.permute.xlu1 %1677 }
 0x44e   :  { %v1691_v8 = vsel %vm715_vm1, %v1678_v48, %v1662_v34  ;;  %v1797_v34 = vld [vmem:[%s4086_s5 + $0x40] sm:$0xff]  ;;  %v2219_v48 = vld [vmem:[%s4086_s5 + $0xd8] sm:$0xff] }
 0x44f   :  { %1723 = vrot.lane.b32.xlu2 %v1691_v8, %s2271_s0  ;;  %1856 = vmatpush.msrb.mxu2 %v1797_v34  ;;  %v2238_v34 = vld [vmem:[%s4086_s5 + $0x160] sm:$0xff] }
 0x451   :  { %1857 = vmatpush.msrb.mxu2 %v1796_v15  ;;  %v2236_v15 = vld [vmem:[%s4086_s5 + $0x150] sm:$0xff] }
 0x455   :  { %v1680_v33 = vpop.permute.xlu0 %1679  ;;  %v1682_v5 = vpop.permute.xlu2 %1681 }
 0x456   :  { %v1693_v18 = vsel %vm715_vm1, %v1682_v5, %v1666_v56  ;;  %v1692_v7 = vsel %vm715_vm1, %v1680_v33, %v1664_v59  ;;  %v1795_v59 = vld [vmem:[%s4086_s5 + $0x30] sm:$0xff]  ;;  %v2217_v5 = vld [vmem:[%s4086_s5 + $0xc8] sm:$0xff] }
 0x457   :  { %1731 = vrot.lane.b32.xlu1 %v1693_v18, %s2271_s0  ;;  %1727 = vrot.lane.b32.xlu0 %v1692_v7, %s2271_s0  ;;  %v2206_v56 = vld [vmem:[%s4086_s5 + $0x90] sm:$0xff]  ;;  %v2216_v18 = vld [vmem:[%s4086_s5 + $0xc0] sm:$0xff] }
 0x458   :  { %1858 = vmatpush.msrb.mxu2 %v1795_v59  ;;  %1829 = vmatpush.msrb.mxu0 %v2206_v56  ;;  %v2218_v33 = vld [vmem:[%s4086_s5 + $0xd0] sm:$0xff]  ;;  %v2241_v7 = vld [vmem:[%s4086_s5 + $0x178] sm:$0xff]  ;;  %v2235_v59 = vld [vmem:[%s4086_s5 + $0x148] sm:$0xff] }
 0x45a   :  { %1859 = vmatpush.msrb.mxu2 %v1794_v27  ;;  %1830 = vmatpush.msrb.mxu0 %v2205_v19  ;;  %v2233_v19 = vld [vmem:[%s4086_s5 + $0x138] sm:$0xff] }
 0x45c   :  { %1860 = vmatpush.msrb.mxu2 %v1793_v44  ;;  %1831 = vmatpush.msrb.mxu0 %v2204_v43  ;;  %v2232_v43 = vld [vmem:[%s4086_s5 + $0x130] sm:$0xff] }
 0x45d   :  { %v1714_v58 = vpop.permute.xlu2 %1713 }
 0x45e   :  { %1861 = vmatpush.msrb.mxu2 %v1792_v13  ;;  %1832 = vmatpush.msrb.mxu0 %v2203_v20  ;;  %v2231_v20 = vld [vmem:[%s4086_s5 + $0x128] sm:$0xff] }
 0x45f   :  { %1733 = vrot.lane.b32.xlu1 %v3798_v54, %s2271_s0  ;;  %1729 = vrot.lane.b32.xlu0 %v3783_v6, %s2271_s0 }
 0x460   :  { %1862 = vmatpush.msrb.mxu2 %v1791_v16  ;;  %1833 = vmatpush.msrb.mxu0 %v2202_v23  ;;  %v2230_v23 = vld [vmem:[%s4086_s5 + $0x120] sm:$0xff] }
 0x462   :  { %1863 = vmatpush.msrb.mxu2 %v1790_v38  ;;  %1834 = vmatpush.msrb.mxu0 %v2201_v4 }
 0x464   :  { %1864 = vmatpush.msrb.mxu2 %v1789_v0  ;;  %1835 = vmatpush.msrb.mxu0 %v2200_v22 }
 0x465   :  { %v1726_v2 = vpop.permute.xlu2 %1725 }
 0x466   :  { %1895 = vmatpush.msra.mxu0 %v2227_v17  ;;  %1939 = vmatpush.msra.mxu2 %v2241_v7 }
 0x468   :  { %1896 = vmatpush.msra.mxu0 %v2226_v26  ;;  %1940 = vmatpush.msra.mxu2 %v2240_v55 }
 0x46a   :  { %1897 = vmatpush.msra.mxu0 %v2225_v25  ;;  %1941 = vmatpush.msra.mxu2 %v2239_v51 }
 0x46c   :  { %1898 = vmatpush.msra.mxu0 %v2224_v62  ;;  %1942 = vmatpush.msra.mxu2 %v2238_v34 }
 0x46e   :  { %1899 = vmatpush.msra.mxu0 %v2223_v61  ;;  %1943 = vmatpush.msra.mxu2 %v2237_v11 }
 0x470   :  { %1944 = vmatpush.msra.mxu2 %v2236_v15 }
 0x472   :  { %1945 = vmatpush.msra.mxu2 %v2235_v59 }
 0x474   :  { %1946 = vmatpush.msra.mxu2 %v2234_v60 }
 0x476   :  { %1947 = vmatpush.msra.mxu2 %v2233_v19 }
 0x478   :  { %1948 = vmatpush.msra.mxu2 %v2232_v43 }
 0x47a   :  { %1949 = vmatpush.msra.mxu2 %v2231_v20 }
 0x47c   :  { %1950 = vmatpush.msra.mxu2 %v2230_v23 }
 0x48d   :  { %v1686_v45 = vpop.permute.xlu1 %1685 }
 0x48e   :  { %v1695_v49 = vsel %vm715_vm1, %v1686_v45, %v1670_v9 }
 0x48f   :  { %1739 = vrot.lane.b32.xlu2 %v1695_v49, %s2271_s0 }
 0x495   :  { %v1684_v37 = vpop.permute.xlu1 %1683  ;;  %v1688_v28 = vpop.permute.xlu0 %1687 }
 0x496   :  { %v1696_v40 = vsel %vm715_vm1, %v1688_v28, %v1672_v47  ;;  %v1694_v39 = vsel %vm715_vm1, %v1684_v37, %v1668_v3 }
 0x497   :  { %1741 = vrot.lane.b32.xlu2 %v3825_v46, %s2271_s0  ;;  %1743 = vrot.lane.b32.xlu0 %v1696_v40, %s2271_s0 }
 0x49d   :  { %v1722_v9 = vpop.permute.xlu1 %1721  ;;  %v1718_v14 = vpop.permute.xlu0 %1717 }
 0x49f   :  { %1735 = vrot.lane.b32.xlu2 %v1694_v39, %s2271_s0 }
 0x4a5   :  { %v1720_v63 = vpop.permute.xlu1 %1719  ;;  %v1716_v41 = vpop.permute.xlu0 %1715 }
 0x4a6   :  { %v1745_v30 = vsel %vm860_vm3, %v1714_v58, %v1716_v41  ;;  %v1746_v1 = vsel %vm860_vm3, %v1718_v14, %v1720_v63 }
 0x4a7   :  { %v1761_v47 = vmax.f32 %v3716_v35, %v1745_v30  ;;  %v1762_v31 = vmax.f32 %v3732_v52, %v1746_v1  ;;  %v2222_v35 = vld [vmem:[%s4086_s5 + $0xf0] sm:$0xff] }
 0x4a8   :  { %1900 = vmatpush.msra.mxu0 %v2222_v35 }
 0x4a9   :  { %v1773_v57 = vadd.f32 %v3978_v12, %v1761_v47  ;;  %v1724_v36 = vpop.permute.xlu2 %1723  ;;  %v1774_v50 = vadd.f32 %v3978_v12, %v1762_v31  ;;  %v2261_v31 = vld [vmem:[%s4087_s6] ss:$0 sm:$0xff] }
 0x4aa   :  { %v1747_v3 = vsel %vm860_vm3, %v1722_v9, %v1724_v36  ;;  %1901 = vmatpush.msra.mxu0 %v2221_v10 }
 0x4ab   :  { %v1781_v42 = vmax.f32 %v1773_v57, 0.0  ;;  %v1763_v24 = vmax.f32 %v3748_v21, %v1747_v3  ;;  %v2220_v21 = vld [vmem:[%s4086_s5 + $0xe0] sm:$0xff]  ;;  %v1782_v8 = vmax.f32 %v1774_v50, 0.0 }
 0x4ac   :  { %1902 = vmatpush.msra.mxu0 %v2220_v21 }
 0x4ad   :  { %v1775_v29 = vadd.f32 %v3978_v12, %v1763_v24  ;;  %2214 = vmatmul.msk.f32.vlgmr.msrb.gmra.mxu2 %vm945_vm2, %v1781_v42  ;;  %v1738_v27 = vpop.permute.xlu1 %1737 }
 0x4ae   :  { %1903 = vmatpush.msra.mxu0 %v2219_v48 }
 0x4af   :  { %v1783_v52 = vmax.f32 %v1775_v29, 0.0 }
 0x4b0   :  { %1904 = vmatpush.msra.mxu0 %v2218_v33 }
 0x4b1   :  { %2212 = vmatmul.msk.f32.vlgmr.msrb.gmra.mxu0 %vm945_vm2, %v1783_v52 }
 0x4b2   :  { %1905 = vmatpush.msra.mxu0 %v2217_v5 }
 0x4b4   :  { %1906 = vmatpush.msra.mxu0 %v2216_v18 }
 0x4b5   :  { %2215 = vmatmul.msk.f32.gmra.mxu2 %vm945_vm2, %v1782_v8 }
 0x4c9   :  { %v1728_v56 = vpop.permute.xlu0 %1727  ;;  %v1732_v0 = vpop.permute.xlu1 %1731 }
 0x4ca   :  { %v1748_v44 = vsel %vm860_vm3, %v1726_v2, %v1728_v56 }
 0x4cb   :  { %v1764_v13 = vmax.f32 %v3764_v32, %v1748_v44 }
 0x4cd   :  { %v1776_v16 = vadd.f32 %v3978_v12, %v1764_v13 }
 0x4cf   :  { %v1784_v38 = vmax.f32 %v1776_v16, 0.0 }
 0x4d1   :  { %2213 = vmatmul.msk.f32.gmra.mxu0 %vm945_vm2, %v1784_v38  ;;  %v1730_v32 = vpop.permute.xlu0 %1729  ;;  %v1734_v25 = vpop.permute.xlu1 %1733 }
 0x4d2   :  { %v1749_v45 = vsel %vm860_vm3, %v1730_v32, %v1732_v0 }
 0x4d3   :  { %v1765_v49 = vmax.f32 %v3783_v6, %v1749_v45 }
 0x4d5   :  { %v1777_v4 = vadd.f32 %v3978_v12, %v1765_v49 }
 0x4d7   :  { %v1785_v22 = vmax.f32 %v1777_v4, 0.0 }
 0x4d9   :  { %2228 = vmatmul.msk.f32.vlgmr.msra.gmra.mxu0 %vm945_vm2, %v1785_v22 }
 0x4e9   :  { %v1740_v37 = vpop.permute.xlu2 %1739 }
 0x4ea   :  { %v1751_v28 = vsel %vm860_vm3, %v1738_v27, %v1740_v37 }
 0x4eb   :  { %v1767_v17 = vmax.f32 %v3811_v53, %v1751_v28 }
 0x4ed   :  { %v1779_v26 = vadd.f32 %v3978_v12, %v1767_v17 }
 0x4ef   :  { %v1787_v40 = vmax.f32 %v1779_v26, 0.0 }
 0x4f1   :  { %v1742_v58 = vpop.permute.xlu2 %1741  ;;  %2242 = vmatmul.msk.f32.vlgmr.msra.gmra.mxu2 %vm945_vm2, %v1787_v40 }
 0x4f9   :  { %v1736_v62 = vpop.permute.xlu2 %1735 }
 0x4fa   :  { %v1750_v6 = vsel %vm860_vm3, %v1734_v25, %v1736_v62 }
 0x4fb   :  { %v1766_v9 = vmax.f32 %v3798_v54, %v1750_v6 }
 0x4fd   :  { %v1778_v14 = vadd.f32 %v3978_v12, %v1766_v9 }
 0x4ff   :  { %v1786_v39 = vmax.f32 %v1778_v14, 0.0 }
 0x501   :  { %2229 = vmatmul.msk.f32.gmra.mxu0 %vm945_vm2, %v1786_v39 }
 0x509   :  { %v1744_v2 = vpop.permute.xlu0 %1743 }
 0x50a   :  { %v1752_v53 = vsel %vm860_vm3, %v1742_v58, %v1744_v2 }
 0x50b   :  { %v1768_v63 = vmax.f32 %v3825_v46, %v1752_v53 }
 0x50d   :  { %v1780_v41 = vadd.f32 %v3978_v12, %v1768_v63 }
 0x50f   :  { %v1788_v30 = vmax.f32 %v1780_v41, 0.0 }
 0x511   :  { %2243 = vmatmul.msk.f32.gmra.mxu2 %vm945_vm2, %v1788_v30 }
 0x52e   :  { %v1837_v47 = vpop.f32.mrf.mxu0 }
 0x530   :  { %v1866_v1 = vpop.f32.mrf.mxu2 }
 0x531   :  { %v1867_v3 = vadd.f32 %v1866_v1, %v1837_v47 }
 0x538   :  { %v1869_v36 = vpop.f32.mrf.mxu2 }
 0x54e   :  { %v1840_v57 = vpop.f32.mrf.mxu0 }
 0x54f   :  { %v1870_v12 = vadd.f32 %v1869_v36, %v1840_v57 }
 0x556   :  { %v1908_v54 = vpop.f32.mrf.mxu0 }
 0x557   :  { %v1914_v61 = vadd.f32 %v1908_v54, %v1867_v3 }
 0x574   :  { %v1952_v42 = vpop.f32.mrf.mxu2 }
 0x575   :  { %v1958_v24 = vadd.f32 %v1952_v42, %v1914_v61 }
 0x577   :  { %v1964_v35 = vadd.f32 %v2261_v31, %v1958_v24 }
 0x579   :  { %1966 = vmax.xlane.f32.xlu0 %v1964_v35 }
 0x57e   :  { %v1911_v46 = vpop.f32.mrf.mxu0 }
 0x57f   :  { %v1915_v29 = vadd.f32 %v1911_v46, %v1870_v12 }
 0x594   :  { %v1955_v10 = vpop.f32.mrf.mxu2 }
 0x595   :  { %v1959_v50 = vadd.f32 %v1955_v10, %v1915_v29 }
 0x597   :  { %v1965_v52 = vadd.f32 %v2261_v31, %v1959_v50 }
 0x599   :  { %1968 = vmax.xlane.f32.xlu1 %v1965_v52 }
 0x5ec   :  { %v1967_v21 = vpop.xlane.xlu0 %1966 }
 0x5ed   :  { %v1970_v48 = vsub.f32 %v1964_v35, %v1967_v21 }
 0x5ef   :  { %v1972_v8 = vmul.f32 1.442695, %v1970_v48 }
 0x5f1   :  { %2262 = vpow2.f32 %v1972_v8 }
 0x5f7   :  { %v2263_v33 = vpop.eup %2262 }
 0x5f8   :  { %1976 = vadd.xlane.f32.xlu2 %v2263_v33 }
 0x60c   :  { %v1969_v5 = vpop.xlane.xlu1 %1968 }
 0x60d   :  { %v1971_v18 = vsub.f32 %v1965_v52, %v1969_v5 }
 0x60f   :  { %v1974_v7 = vmul.f32 1.442695, %v1971_v18 }
 0x611   :  { %2264 = vpow2.f32 %v1974_v7 }
 0x617   :  { %v2265_v55 = vpop.eup %2264 }
 0x618   :  { %1978 = vadd.xlane.f32.xlu2 %v2265_v55 }
 0x66b   :  { %v1977_v51 = vpop.xlane.xlu2 %1976 }
 0x66c   :  { %2266 = vlog2.f32 %v1977_v51 }
 0x672   :  { %v2267_v34 = vpop.eup %2266 }
 0x673   :  { %v1981_v11 = vmul.f32 0.6931472, %v2267_v34 }
 0x675   :  { %v1984_v15 = vsub.f32 %v1970_v48, %v1981_v11 }
 0x677   :  { %1986 = vst [vmem:[%s4088_s7] sm:$0xff] %v1984_v15 }
 0x68b   :  { %v1979_v59 = vpop.xlane.xlu2 %1978 }
 0x68c   :  { %2268 = vlog2.f32 %v1979_v59 }
 0x692   :  { %v2269_v60 = vpop.eup %2268 }
 0x693   :  { %v1983_v27 = vmul.f32 0.6931472, %v2269_v60 }
 0x695   :  { %v1985_v56 = vsub.f32 %v1971_v18, %v1983_v27 }
 0x697   :  { %1987 = vst [vmem:[%s4088_s7 + $0x8] sm:$0xff] %v1985_v56 }

</bundles_post_ra>
